<compile_context>
chip_gen: v6e
topology: v6e:2x2x1
jax: 0.10.0
libtpu: 0.0.40
codegen_flags: <defaults>
</compile_context>

<pallas_src>
import functools

import jax
import jax.numpy as jnp
from jax import lax
from jax.experimental import pallas as pl
from jax.experimental.pallas import tpu as pltpu


# ----------------------------- fused kernel ---------------------------------


def _inverted_residual_kernel(*refs, H, W, Ho, Wo, B, stride, expand, use_res):
    """One grid step = B images; all three stages fused, channel-major."""
    refs = list(refs)
    o_ref = refs.pop()                       # (B, Cout, Ho*Wo)
    x_ref = refs.pop(0)                      # (B, Cin, H*W)
    if expand:
        w1_ref, b1_ref, a1_ref = refs[:3]
        refs = refs[3:]
    wdw_ref, b2_ref, a2_ref, m_ref, w3_ref, b3_ref = refs[:6]
    s_ref = refs[6] if stride == 2 else None

    f32 = jnp.float32
    HW, HoWo = H * W, Ho * Wo
    L = B * HW

    # -- gather the B images into one lane-dense (C, B*H*W) slab -------------
    if B == 1:
        xc = x_ref[0]
    else:
        xc = jnp.concatenate([x_ref[b] for b in range(B)], axis=-1)
    xf = xc.astype(f32)                                        # (Cin, L)

    # -- stage 1: 1x1 expand (BN scale folded into w1) + bias + PReLU --------
    if expand:
        h = jnp.dot(w1_ref[...], xc.astype(w1_ref.dtype),
                    preferred_element_type=f32)                # (Chid, L)
        h = h + b1_ref[...]
        h = jnp.where(h > 0, h, a1_ref[...] * h)
    else:
        h = xf                                                 # Chid == Cin

    # -- stage 2: depthwise 3x3 (BN scale folded into wdw) -------------------
    def shift(v, off):
        # y[:, l] = v[:, l + off], zero-filled outside the slab.
        # Unambiguous static lane slices; pltpu.roll(v, -off, 1) is the native
        # XLU alternative once the rotation direction is pinned down.
        if off == 0:
            return v
        pad = jnp.zeros((v.shape[0], abs(off)), v.dtype)
        if off > 0:
            return jnp.concatenate([v[:, off:], pad], axis=-1)
        return jnp.concatenate([pad, v[:, :L + off]], axis=-1)

    m = m_ref[...]                            # (4, L) 0/1 boundary masks
    rm1, rp1, cm1, cp1 = m[0:1], m[1:2], m[2:3], m[3:4]

    h_up = rm1 * shift(h, -W)                 # in(i-1, j)
    h_dn = rp1 * shift(h, +W)                 # in(i+1, j)

    wdw = wdw_ref[...]                        # (Chid, 9), k = kh*3 + kw

    def wk(k):
        return wdw[:, k:k + 1]                # per-channel tap weight

    q_m1 = wk(0) * h_up + wk(3) * h + wk(6) * h_dn   # kernel column kw=0
    q_0 = wk(1) * h_up + wk(4) * h + wk(7) * h_dn    # kw=1
    q_p1 = wk(2) * h_up + wk(5) * h + wk(8) * h_dn   # kw=2

    dw = q_0 + cm1 * shift(q_m1, -1) + cp1 * shift(q_p1, +1)   # (Chid, L)

    if stride == 2:
        # subsample to the even output grid with a tiny one-hot MXU matmul
        parts = [jnp.dot(dw[:, b * HW:(b + 1) * HW], s_ref[...],
                         preferred_element_type=f32) for b in range(B)]
        dw = parts[0] if B == 1 else jnp.concatenate(parts, axis=-1)

    dw = dw + b2_ref[...]
    dw = jnp.where(dw > 0, dw, a2_ref[...] * dw)               # (Chid, B*HoWo)

    # -- stage 3: 1x1 projection (BN scale folded into w3) + bias (+residual)
    out = jnp.dot(w3_ref[...], dw.astype(w3_ref.dtype),
                  preferred_element_type=f32)                  # (Cout, B*HoWo)
    out = out + b3_ref[...]
    if use_res:
        out = out + xf

    for b in range(B):
        o_ref[b] = out[:, b * HoWo:(b + 1) * HoWo].astype(o_ref.dtype)


# ----------------------------- wrapper ---------------------------------------


def _fold_bn(gamma, beta, mean, var, eps=1e-5):
    scale = gamma / jnp.sqrt(var + eps)
    return scale, beta - mean * scale


def _pick_batch_block(N, per_img_bytes, budget=24 << 20):
    """Largest divisor of N within the VMEM budget that keeps >= 2 grid steps
    (so both v7x TensorCores get work)."""
    best = 1
    for b in range(1, N + 1):
        if N % b == 0 and b * per_img_bytes <= budget and (N // b >= 2 or N == 1):
            best = b
    return best


def _vmem_limit_bytes(B, Cin, Chid, Cout, HW, HoWo, stride):
    io = 2 * 4 * B * (Cin * HW + Cout * HoWo)     # double-buffered in/out blocks
    hidden = 10 * 4 * Chid * B * HW               # live f32 activation temps
    consts = 4 * (Chid * (Cin + 16) + Cout * (Chid + 1) + 4 * B * HW)
    if stride == 2:
        consts += 4 * HW * HoWo
    return int(min(max(io + hidden + consts + (4 << 20), 16 << 20), 64 << 20))


def inverted_residual_pallas(x_nchw, p, *, stride, expand_ratio,
                             mxu_dtype=jnp.bfloat16):
    N, Cin, H, W = x_nchw.shape
    expand = expand_ratio != 1
    Chid = p["wdw"].shape[-1]
    Cout = p["w3"].shape[1]
    use_res = (stride == 1) and (Cin == Cout)
    Ho = (H - 1) // stride + 1
    Wo = (W - 1) // stride + 1
    HW, HoWo = H * W, Ho * Wo
    if stride == 2:
        assert H % 2 == 0 and W % 2 == 0, "stride-2 path assumes even H, W"

    # ---- batch blocking ----------------------------------------------------
    per_img = 4 * HW * (Cin + Cout + 12 * Chid)
    B = _pick_batch_block(N, per_img)
    L = B * HW

    # ---- fold inference BatchNorm scales into the conv weights -------------
    s2, b2 = _fold_bn(p["g2"], p["be2"], p["m2"], p["v2"])
    s3, b3 = _fold_bn(p["g3"], p["be3"], p["m3"], p["v3"])
    wdw = (p["wdw"] * s2[None, None, :]).reshape(9, Chid).T    # (Chid, 9)
    wdw = wdw.astype(jnp.float32)
    w3t = (p["w3"] * s3[None, :]).T.astype(mxu_dtype)          # (Cout, Chid)

    # ---- boundary masks for the lane-shifted depthwise taps ----------------
    li = jnp.arange(L, dtype=jnp.int32) % HW
    ii, jj = li // W, li % W
    masks = jnp.stack([ii >= 1, ii <= H - 2, jj >= 1, jj <= W - 2],
                      axis=0).astype(jnp.float32)              # (4, L)

    x3 = x_nchw.reshape(N, Cin, HW)                            # free NCHW reshape

    def const_spec(shape):
        return pl.BlockSpec(shape, lambda n: (0, 0))

    inputs = [x3]
    in_specs = [pl.BlockSpec((B, Cin, HW), lambda n: (n, 0, 0))]

    if expand:
        s1, b1 = _fold_bn(p["g1"], p["be1"], p["m1"], p["v1"])
        w1t = (p["w1"] * s1[None, :]).T.astype(mxu_dtype)      # (Chid, Cin)
        inputs += [w1t, b1.reshape(Chid, 1), p["a1"].reshape(Chid, 1)]
        in_specs += [const_spec((Chid, Cin)), const_spec((Chid, 1)),
                     const_spec((Chid, 1))]

    inputs += [wdw, b2.reshape(Chid, 1), p["a2"].reshape(Chid, 1),
               masks, w3t, b3.reshape(Cout, 1)]
    in_specs += [const_spec((Chid, 9)), const_spec((Chid, 1)),
                 const_spec((Chid, 1)), const_spec((4, L)),
                 const_spec((Cout, Chid)), const_spec((Cout, 1))]

    if stride == 2:
        sel = (2 * (jnp.arange(Ho)[:, None] * W + jnp.arange(Wo)[None, :])
               ).reshape(-1)
        S = (jnp.arange(HW)[:, None] == sel[None, :]).astype(jnp.float32)
        inputs += [S]
        in_specs += [const_spec((HW, HoWo))]

    kern = functools.partial(_inverted_residual_kernel,
                             H=H, W=W, Ho=Ho, Wo=Wo, B=B, stride=stride,
                             expand=expand, use_res=use_res)

    out3 = pl.pallas_call(
        kern,
        out_shape=jax.ShapeDtypeStruct((N, Cout, HoWo), x_nchw.dtype),
        grid=(N // B,),
        in_specs=in_specs,
        out_specs=pl.BlockSpec((B, Cout, HoWo), lambda n: (n, 0, 0)),
        compiler_params=pltpu.CompilerParams(
            dimension_semantics=("parallel",),
            vmem_limit_bytes=_vmem_limit_bytes(B, Cin, Chid, Cout, HW, HoWo,
                                               stride)),
    )(*inputs)
    return out3.reshape(N, Cout, Ho, Wo)


# ----------------------------- reference -------------------------------------


def inverted_residual_ref(x_nchw, p, *, stride, expand_ratio):
    N, Cin, H, W = x_nchw.shape
    Cout = p["w3"].shape[1]
    use_res = (stride == 1) and (Cin == Cout)
    hp = lax.Precision.HIGHEST
    x = jnp.transpose(x_nchw, (0, 2, 3, 1))
    h = x
    dn = ("NHWC", "HWIO", "NHWC")
    if expand_ratio != 1:
        h = lax.conv_general_dilated(h, p["w1"][None, None], (1, 1),
                                     ((0, 0), (0, 0)), dimension_numbers=dn,
                                     precision=hp)
        s, b = _fold_bn(p["g1"], p["be1"], p["m1"], p["v1"])
        h = h * s + b
        h = jnp.where(h > 0, h, p["a1"] * h)
    C = h.shape[-1]
    h = lax.conv_general_dilated(h, p["wdw"][:, :, None, :], (stride, stride),
                                 ((1, 1), (1, 1)), dimension_numbers=dn,
                                 feature_group_count=C, precision=hp)
    s, b = _fold_bn(p["g2"], p["be2"], p["m2"], p["v2"])
    h = h * s + b
    h = jnp.where(h > 0, h, p["a2"] * h)
    h = lax.conv_general_dilated(h, p["w3"][None, None], (1, 1),
                                 ((0, 0), (0, 0)), dimension_numbers=dn,
                                 precision=hp)
    s, b = _fold_bn(p["g3"], p["be3"], p["m3"], p["v3"])
    h = h * s + b
    if use_res:
        h = h + x
    return jnp.transpose(h, (0, 3, 1, 2))


# ----------------------------- params ----------------------------------------


def _make_params(key, Cin, Cout, expand_ratio):
    Chid = int(round(Cin * expand_ratio))
    ks = jax.random.split(key, 20)
    f32 = jnp.float32

    def bn(k0, k1, k2, k3, c):
        return (1.0 + 0.1 * jax.random.normal(k0, (c,), f32),     # gamma
                0.1 * jax.random.normal(k1, (c,), f32),            # beta
                0.1 * jax.random.normal(k2, (c,), f32),            # running_mean
                0.5 + jnp.abs(jax.random.normal(k3, (c,), f32)))   # running_var

    p = {}
    p["w1"] = 0.1 * jax.random.normal(ks[0], (Cin, Chid), f32)
    p["g1"], p["be1"], p["m1"], p["v1"] = bn(ks[1], ks[2], ks[3], ks[4], Chid)
    p["a1"] = jnp.full((Chid,), 0.25, f32)            # PReLU init=0.25
    p["wdw"] = 0.1 * jax.random.normal(ks[5], (3, 3, Chid), f32)
    p["g2"], p["be2"], p["m2"], p["v2"] = bn(ks[6], ks[7], ks[8], ks[9], Chid)
    p["a2"] = jnp.full((Chid,), 0.25, f32)
    p["w3"] = 0.1 * jax.random.normal(ks[10], (Chid, Cout), f32)
    p["g3"], p["be3"], p["m3"], p["v3"] = bn(ks[11], ks[12], ks[13], ks[14], Cout)
    return p


# ----------------------------- main -------------------------------------------


if __name__ == "__main__":
    key = jax.random.PRNGKey(0)
    k1, k2, k3, k4 = jax.random.split(key, 4)

    # --- config A: stride=1, expand_ratio=2 -> residual connection ----------
    N, Cin, Cout, H, W = 4, 16, 16, 16, 16
    x = jax.random.normal(k1, (N, Cin, H, W), jnp.float32)
    params = _make_params(k2, Cin, Cout, 2)
    ref = inverted_residual_ref(x, params, stride=1, expand_ratio=2)

    out_bf16 = jax.block_until_ready(
        inverted_residual_pallas(x, params, stride=1, expand_ratio=2,
                                 mxu_dtype=jnp.bfloat16))
    assert out_bf16.shape == ref.shape
    assert jnp.allclose(out_bf16, ref, atol=5e-2, rtol=5e-2), \
        "bf16-MXU path mismatch vs reference"

    out_f32 = jax.block_until_ready(
        inverted_residual_pallas(x, params, stride=1, expand_ratio=2,
                                 mxu_dtype=jnp.float32))
    assert jnp.allclose(out_f32, ref, atol=1e-3, rtol=1e-3), \
        "f32-MXU path mismatch vs reference"

    # --- config B: stride=2, expand_ratio=1 -> no expand conv, no residual --
    N2, Cin2, Cout2 = 2, 16, 24
    x2 = jax.random.normal(k3, (N2, Cin2, H, W), jnp.float32)
    params2 = _make_params(k4, Cin2, Cout2, 1)
    ref2 = inverted_residual_ref(x2, params2, stride=2, expand_ratio=1)
    out2 = jax.block_until_ready(
        inverted_residual_pallas(x2, params2, stride=2, expand_ratio=1,
                                 mxu_dtype=jnp.float32))
    assert out2.shape == (N2, Cout2, 8, 8)
    assert jnp.allclose(out2, ref2, atol=1e-3, rtol=1e-3), \
        "stride-2 / expand_ratio=1 path mismatch vs reference"

    print("KERNEL_OK")
</pallas_src>

<mosaic_0001>
module attributes {stable_mosaic.version = 11 : i64} {
  func.func @_inverted_residual_kernel(%arg0: i32, %arg1: memref<2x16x256xf32, #tpu.memory_space<vmem>>, %arg2: memref<32x16xbf16, #tpu.memory_space<vmem>>, %arg3: memref<32x1xf32, #tpu.memory_space<vmem>>, %arg4: memref<32x1xf32, #tpu.memory_space<vmem>>, %arg5: memref<32x9xf32, #tpu.memory_space<vmem>>, %arg6: memref<32x1xf32, #tpu.memory_space<vmem>>, %arg7: memref<32x1xf32, #tpu.memory_space<vmem>>, %arg8: memref<4x512xf32, #tpu.memory_space<vmem>>, %arg9: memref<16x32xbf16, #tpu.memory_space<vmem>>, %arg10: memref<16x1xf32, #tpu.memory_space<vmem>>, %arg11: memref<2x16x256xf32, #tpu.memory_space<vmem>>) attributes {dimension_semantics = [#tpu.dimension_semantics<parallel>], iteration_bounds = array<i64: 2>, scalar_prefetch = 0 : i64, scratch_operands = 0 : i64, tpu.core_type = #tpu.core_type<tc>, window_params = [{transform_indices = @transform_0, window_bounds = array<i64: 2, 16, 256>}, {pipeline_mode = #tpu.pipeline_mode<synchronous>, transform_indices = @transform_1, window_bounds = array<i64: 32, 16>}, {pipeline_mode = #tpu.pipeline_mode<synchronous>, transform_indices = @transform_2, window_bounds = array<i64: 32, 1>}, {pipeline_mode = #tpu.pipeline_mode<synchronous>, transform_indices = @transform_3, window_bounds = array<i64: 32, 1>}, {pipeline_mode = #tpu.pipeline_mode<synchronous>, transform_indices = @transform_4, window_bounds = array<i64: 32, 9>}, {pipeline_mode = #tpu.pipeline_mode<synchronous>, transform_indices = @transform_5, window_bounds = array<i64: 32, 1>}, {pipeline_mode = #tpu.pipeline_mode<synchronous>, transform_indices = @transform_6, window_bounds = array<i64: 32, 1>}, {pipeline_mode = #tpu.pipeline_mode<synchronous>, transform_indices = @transform_7, window_bounds = array<i64: 4, 512>}, {pipeline_mode = #tpu.pipeline_mode<synchronous>, transform_indices = @transform_8, window_bounds = array<i64: 16, 32>}, {pipeline_mode = #tpu.pipeline_mode<synchronous>, transform_indices = @transform_9, window_bounds = array<i64: 16, 1>}, {transform_indices = @transform_10, window_bounds = array<i64: 2, 16, 256>}]} {
    %c0 = arith.constant 0 : index
    %c0_0 = arith.constant 0 : index
    %c0_1 = arith.constant 0 : index
    %0 = vector.load %arg1[%c0, %c0_0, %c0_1] : memref<2x16x256xf32, #tpu.memory_space<vmem>>, vector<1x16x256xf32>
    %1 = vector.shape_cast %0 : vector<1x16x256xf32> to vector<16x256xf32>
    %c1 = arith.constant 1 : index
    %c0_2 = arith.constant 0 : index
    %c0_3 = arith.constant 0 : index
    %2 = vector.load %arg1[%c1, %c0_2, %c0_3] : memref<2x16x256xf32, #tpu.memory_space<vmem>>, vector<1x16x256xf32>
    %3 = vector.shape_cast %2 : vector<1x16x256xf32> to vector<16x256xf32>
    %4 = tpu.concatenate %1, %3 in 1 : vector<16x256xf32>, vector<16x256xf32> -> vector<16x512xf32>
    %c0_4 = arith.constant 0 : index
    %c0_5 = arith.constant 0 : index
    %5 = vector.load %arg2[%c0_4, %c0_5] : memref<32x16xbf16, #tpu.memory_space<vmem>>, vector<32x16xbf16>
    %6 = arith.truncf %4 : vector<16x512xf32> to vector<16x512xbf16>
    %cst = arith.constant dense<0.000000e+00> : vector<32x512xf32>
    %7 = tpu.matmul %5, %6, %cst {dimension_numbers = #tpu.dot_dimension_numbers<[1], [0], [0], [1], [0, 0, 1, 1], [], []>} : vector<32x16xbf16>, vector<16x512xbf16>, vector<32x512xf32> -> vector<32x512xf32>
    %c0_6 = arith.constant 0 : index
    %c0_7 = arith.constant 0 : index
    %8 = vector.load %arg3[%c0_6, %c0_7] : memref<32x1xf32, #tpu.memory_space<vmem>>, vector<32x1xf32>
    %9 = vector.broadcast %8 : vector<32x1xf32> to vector<32x512xf32>
    %10 = arith.addf %7, %9 : vector<32x512xf32>
    %cst_8 = arith.constant 0.000000e+00 : f32
    %11 = vector.broadcast %cst_8 : f32 to vector<32x512xf32>
    %12 = arith.cmpf ogt, %10, %11 : vector<32x512xf32>
    %c0_9 = arith.constant 0 : index
    %c0_10 = arith.constant 0 : index
    %13 = vector.load %arg4[%c0_9, %c0_10] : memref<32x1xf32, #tpu.memory_space<vmem>>, vector<32x1xf32>
    %14 = vector.broadcast %13 : vector<32x1xf32> to vector<32x512xf32>
    %15 = arith.mulf %14, %10 : vector<32x512xf32>
    %16 = arith.select %12, %10, %15 : vector<32x512xi1>, vector<32x512xf32>
    %c0_11 = arith.constant 0 : index
    %c0_12 = arith.constant 0 : index
    %17 = vector.load %arg8[%c0_11, %c0_12] : memref<4x512xf32, #tpu.memory_space<vmem>>, vector<4x512xf32>
    %18 = vector.extract_strided_slice %17 {offsets = [0, 0], sizes = [1, 512], strides = [1, 1]} : vector<4x512xf32> to vector<1x512xf32>
    %19 = vector.extract_strided_slice %17 {offsets = [1, 0], sizes = [1, 512], strides = [1, 1]} : vector<4x512xf32> to vector<1x512xf32>
    %20 = vector.extract_strided_slice %17 {offsets = [2, 0], sizes = [1, 512], strides = [1, 1]} : vector<4x512xf32> to vector<1x512xf32>
    %21 = vector.extract_strided_slice %17 {offsets = [3, 0], sizes = [1, 512], strides = [1, 1]} : vector<4x512xf32> to vector<1x512xf32>
    %cst_13 = arith.constant 0.000000e+00 : f32
    %22 = vector.broadcast %cst_13 : f32 to vector<32x16xf32>
    %23 = vector.extract_strided_slice %16 {offsets = [0, 0], sizes = [32, 496], strides = [1, 1]} : vector<32x512xf32> to vector<32x496xf32>
    %24 = tpu.concatenate %22, %23 in 1 : vector<32x16xf32>, vector<32x496xf32> -> vector<32x512xf32>
    %25 = vector.broadcast %18 : vector<1x512xf32> to vector<32x512xf32>
    %26 = arith.mulf %25, %24 : vector<32x512xf32>
    %cst_14 = arith.constant 0.000000e+00 : f32
    %27 = vector.broadcast %cst_14 : f32 to vector<32x16xf32>
    %28 = vector.extract_strided_slice %16 {offsets = [0, 16], sizes = [32, 496], strides = [1, 1]} : vector<32x512xf32> to vector<32x496xf32>
    %29 = tpu.concatenate %28, %27 in 1 : vector<32x496xf32>, vector<32x16xf32> -> vector<32x512xf32>
    %30 = vector.broadcast %19 : vector<1x512xf32> to vector<32x512xf32>
    %31 = arith.mulf %30, %29 : vector<32x512xf32>
    %c0_15 = arith.constant 0 : index
    %c0_16 = arith.constant 0 : index
    %32 = vector.load %arg5[%c0_15, %c0_16] : memref<32x9xf32, #tpu.memory_space<vmem>>, vector<32x9xf32>
    %33 = vector.extract_strided_slice %32 {offsets = [0, 0], sizes = [32, 1], strides = [1, 1]} : vector<32x9xf32> to vector<32x1xf32>
    %34 = vector.broadcast %33 : vector<32x1xf32> to vector<32x512xf32>
    %35 = arith.mulf %34, %26 : vector<32x512xf32>
    %36 = vector.extract_strided_slice %32 {offsets = [0, 3], sizes = [32, 1], strides = [1, 1]} : vector<32x9xf32> to vector<32x1xf32>
    %37 = vector.broadcast %36 : vector<32x1xf32> to vector<32x512xf32>
    %38 = arith.mulf %37, %16 : vector<32x512xf32>
    %39 = arith.addf %35, %38 : vector<32x512xf32>
    %40 = vector.extract_strided_slice %32 {offsets = [0, 6], sizes = [32, 1], strides = [1, 1]} : vector<32x9xf32> to vector<32x1xf32>
    %41 = vector.broadcast %40 : vector<32x1xf32> to vector<32x512xf32>
    %42 = arith.mulf %41, %31 : vector<32x512xf32>
    %43 = arith.addf %39, %42 : vector<32x512xf32>
    %44 = vector.extract_strided_slice %32 {offsets = [0, 1], sizes = [32, 1], strides = [1, 1]} : vector<32x9xf32> to vector<32x1xf32>
    %45 = vector.broadcast %44 : vector<32x1xf32> to vector<32x512xf32>
    %46 = arith.mulf %45, %26 : vector<32x512xf32>
    %47 = vector.extract_strided_slice %32 {offsets = [0, 4], sizes = [32, 1], strides = [1, 1]} : vector<32x9xf32> to vector<32x1xf32>
    %48 = vector.broadcast %47 : vector<32x1xf32> to vector<32x512xf32>
    %49 = arith.mulf %48, %16 : vector<32x512xf32>
    %50 = arith.addf %46, %49 : vector<32x512xf32>
    %51 = vector.extract_strided_slice %32 {offsets = [0, 7], sizes = [32, 1], strides = [1, 1]} : vector<32x9xf32> to vector<32x1xf32>
    %52 = vector.broadcast %51 : vector<32x1xf32> to vector<32x512xf32>
    %53 = arith.mulf %52, %31 : vector<32x512xf32>
    %54 = arith.addf %50, %53 : vector<32x512xf32>
    %55 = vector.extract_strided_slice %32 {offsets = [0, 2], sizes = [32, 1], strides = [1, 1]} : vector<32x9xf32> to vector<32x1xf32>
    %56 = vector.broadcast %55 : vector<32x1xf32> to vector<32x512xf32>
    %57 = arith.mulf %56, %26 : vector<32x512xf32>
    %58 = vector.extract_strided_slice %32 {offsets = [0, 5], sizes = [32, 1], strides = [1, 1]} : vector<32x9xf32> to vector<32x1xf32>
    %59 = vector.broadcast %58 : vector<32x1xf32> to vector<32x512xf32>
    %60 = arith.mulf %59, %16 : vector<32x512xf32>
    %61 = arith.addf %57, %60 : vector<32x512xf32>
    %62 = vector.extract_strided_slice %32 {offsets = [0, 8], sizes = [32, 1], strides = [1, 1]} : vector<32x9xf32> to vector<32x1xf32>
    %63 = vector.broadcast %62 : vector<32x1xf32> to vector<32x512xf32>
    %64 = arith.mulf %63, %31 : vector<32x512xf32>
    %65 = arith.addf %61, %64 : vector<32x512xf32>
    %cst_17 = arith.constant 0.000000e+00 : f32
    %66 = vector.broadcast %cst_17 : f32 to vector<32x1xf32>
    %67 = vector.extract_strided_slice %43 {offsets = [0, 0], sizes = [32, 511], strides = [1, 1]} : vector<32x512xf32> to vector<32x511xf32>
    %68 = tpu.concatenate %66, %67 in 1 : vector<32x1xf32>, vector<32x511xf32> -> vector<32x512xf32>
    %69 = vector.broadcast %20 : vector<1x512xf32> to vector<32x512xf32>
    %70 = arith.mulf %69, %68 : vector<32x512xf32>
    %71 = arith.addf %54, %70 : vector<32x512xf32>
    %cst_18 = arith.constant 0.000000e+00 : f32
    %72 = vector.broadcast %cst_18 : f32 to vector<32x1xf32>
    %73 = vector.extract_strided_slice %65 {offsets = [0, 1], sizes = [32, 511], strides = [1, 1]} : vector<32x512xf32> to vector<32x511xf32>
    %74 = tpu.concatenate %73, %72 in 1 : vector<32x511xf32>, vector<32x1xf32> -> vector<32x512xf32>
    %75 = vector.broadcast %21 : vector<1x512xf32> to vector<32x512xf32>
    %76 = arith.mulf %75, %74 : vector<32x512xf32>
    %77 = arith.addf %71, %76 : vector<32x512xf32>
    %c0_19 = arith.constant 0 : index
    %c0_20 = arith.constant 0 : index
    %78 = vector.load %arg6[%c0_19, %c0_20] : memref<32x1xf32, #tpu.memory_space<vmem>>, vector<32x1xf32>
    %79 = vector.broadcast %78 : vector<32x1xf32> to vector<32x512xf32>
    %80 = arith.addf %77, %79 : vector<32x512xf32>
    %cst_21 = arith.constant 0.000000e+00 : f32
    %81 = vector.broadcast %cst_21 : f32 to vector<32x512xf32>
    %82 = arith.cmpf ogt, %80, %81 : vector<32x512xf32>
    %c0_22 = arith.constant 0 : index
    %c0_23 = arith.constant 0 : index
    %83 = vector.load %arg7[%c0_22, %c0_23] : memref<32x1xf32, #tpu.memory_space<vmem>>, vector<32x1xf32>
    %84 = vector.broadcast %83 : vector<32x1xf32> to vector<32x512xf32>
    %85 = arith.mulf %84, %80 : vector<32x512xf32>
    %86 = arith.select %82, %80, %85 : vector<32x512xi1>, vector<32x512xf32>
    %c0_24 = arith.constant 0 : index
    %c0_25 = arith.constant 0 : index
    %87 = vector.load %arg9[%c0_24, %c0_25] : memref<16x32xbf16, #tpu.memory_space<vmem>>, vector<16x32xbf16>
    %88 = arith.truncf %86 : vector<32x512xf32> to vector<32x512xbf16>
    %cst_26 = arith.constant dense<0.000000e+00> : vector<16x512xf32>
    %89 = tpu.matmul %87, %88, %cst_26 {dimension_numbers = #tpu.dot_dimension_numbers<[1], [0], [0], [1], [0, 0, 1, 1], [], []>} : vector<16x32xbf16>, vector<32x512xbf16>, vector<16x512xf32> -> vector<16x512xf32>
    %c0_27 = arith.constant 0 : index
    %c0_28 = arith.constant 0 : index
    %90 = vector.load %arg10[%c0_27, %c0_28] : memref<16x1xf32, #tpu.memory_space<vmem>>, vector<16x1xf32>
    %91 = vector.broadcast %90 : vector<16x1xf32> to vector<16x512xf32>
    %92 = arith.addf %89, %91 : vector<16x512xf32>
    %93 = arith.addf %92, %4 : vector<16x512xf32>
    %94 = vector.extract_strided_slice %93 {offsets = [0, 0], sizes = [16, 256], strides = [1, 1]} : vector<16x512xf32> to vector<16x256xf32>
    %c0_29 = arith.constant 0 : index
    %c0_30 = arith.constant 0 : index
    %c0_31 = arith.constant 0 : index
    %95 = vector.load %arg11[%c0_29, %c0_30, %c0_31] : memref<2x16x256xf32, #tpu.memory_space<vmem>>, vector<1x16x256xf32>
    %96 = vector.shape_cast %95 : vector<1x16x256xf32> to vector<16x256xf32>
    %97 = vector.shape_cast %94 : vector<16x256xf32> to vector<1x16x256xf32>
    tpu.vector_store %arg11[%c0_29, %c0_30, %c0_31], %97 {strides = array<i32>} : memref<2x16x256xf32, #tpu.memory_space<vmem>>, vector<1x16x256xf32>,
    %98 = vector.extract_strided_slice %93 {offsets = [0, 256], sizes = [16, 256], strides = [1, 1]} : vector<16x512xf32> to vector<16x256xf32>
    %c1_32 = arith.constant 1 : index
    %c0_33 = arith.constant 0 : index
    %c0_34 = arith.constant 0 : index
    %99 = vector.load %arg11[%c1_32, %c0_33, %c0_34] : memref<2x16x256xf32, #tpu.memory_space<vmem>>, vector<1x16x256xf32>
    %100 = vector.shape_cast %99 : vector<1x16x256xf32> to vector<16x256xf32>
    %101 = vector.shape_cast %98 : vector<16x256xf32> to vector<1x16x256xf32>
    tpu.vector_store %arg11[%c1_32, %c0_33, %c0_34], %101 {strides = array<i32>} : memref<2x16x256xf32, #tpu.memory_space<vmem>>, vector<1x16x256xf32>,
    return
  }
  func.func @transform_0(%arg0: i32) -> (i32, i32, i32) {
    %c0_i32 = arith.constant 0 : i32
    %c0_i32_0 = arith.constant 0 : i32
    %c0_i32_1 = arith.constant 0 : i32
    return %arg0, %c0_i32, %c0_i32_0 : i32, i32, i32
  }
  func.func @transform_1(%arg0: i32) -> (i32, i32) {
    %c0_i32 = arith.constant 0 : i32
    %c0_i32_0 = arith.constant 0 : i32
    %c0_i32_1 = arith.constant 0 : i32
    return %c0_i32, %c0_i32_0 : i32, i32
  }
  func.func @transform_2(%arg0: i32) -> (i32, i32) {
    %c0_i32 = arith.constant 0 : i32
    %c0_i32_0 = arith.constant 0 : i32
    %c0_i32_1 = arith.constant 0 : i32
    return %c0_i32, %c0_i32_0 : i32, i32
  }
  func.func @transform_3(%arg0: i32) -> (i32, i32) {
    %c0_i32 = arith.constant 0 : i32
    %c0_i32_0 = arith.constant 0 : i32
    %c0_i32_1 = arith.constant 0 : i32
    return %c0_i32, %c0_i32_0 : i32, i32
  }
  func.func @transform_4(%arg0: i32) -> (i32, i32) {
    %c0_i32 = arith.constant 0 : i32
    %c0_i32_0 = arith.constant 0 : i32
    %c0_i32_1 = arith.constant 0 : i32
    return %c0_i32, %c0_i32_0 : i32, i32
  }
  func.func @transform_5(%arg0: i32) -> (i32, i32) {
    %c0_i32 = arith.constant 0 : i32
    %c0_i32_0 = arith.constant 0 : i32
    %c0_i32_1 = arith.constant 0 : i32
    return %c0_i32, %c0_i32_0 : i32, i32
  }
  func.func @transform_6(%arg0: i32) -> (i32, i32) {
    %c0_i32 = arith.constant 0 : i32
    %c0_i32_0 = arith.constant 0 : i32
    %c0_i32_1 = arith.constant 0 : i32
    return %c0_i32, %c0_i32_0 : i32, i32
  }
  func.func @transform_7(%arg0: i32) -> (i32, i32) {
    %c0_i32 = arith.constant 0 : i32
    %c0_i32_0 = arith.constant 0 : i32
    %c0_i32_1 = arith.constant 0 : i32
    return %c0_i32, %c0_i32_0 : i32, i32
  }
  func.func @transform_8(%arg0: i32) -> (i32, i32) {
    %c0_i32 = arith.constant 0 : i32
    %c0_i32_0 = arith.constant 0 : i32
    %c0_i32_1 = arith.constant 0 : i32
    return %c0_i32, %c0_i32_0 : i32, i32
  }
  func.func @transform_9(%arg0: i32) -> (i32, i32) {
    %c0_i32 = arith.constant 0 : i32
    %c0_i32_0 = arith.constant 0 : i32
    %c0_i32_1 = arith.constant 0 : i32
    return %c0_i32, %c0_i32_0 : i32, i32
  }
  func.func @transform_10(%arg0: i32) -> (i32, i32, i32) {
    %c0_i32 = arith.constant 0 : i32
    %c0_i32_0 = arith.constant 0 : i32
    %c0_i32_1 = arith.constant 0 : i32
    return %arg0, %c0_i32, %c0_i32_0 : i32, i32, i32
  }
}

</mosaic_0001>

<bundles_post_ra>
// kernel: tpu_custom_call.1
= control target key start
LH: loop header
LB: loop body
LE: loop exit
PB: predicated region body
PF: predicated region fallthrough
CT: control target
= control target key end

     0   :  { %15 = vsyncpa [#allocation3], 0  ;;  %s3338_s0 = inlined_call_operand.vmem [shape: f32[4,16,256], index: 0, kind: input, shape index: {}]   ;;  %s3339_s1 = inlined_call_operand.vmem [shape: bf16[32,16], index: 1, kind: input, shape index: {}]   ;;  %s3340_s2 = inlined_call_operand.vmem [shape: f32[32,1], index: 2, kind: input, shape index: {}]   ;;  %s3341_s3 = inlined_call_operand.vmem [shape: f32[32,1], index: 3, kind: input, shape index: {}]   ;;  %s3342_s4 = inlined_call_operand.vmem [shape: f32[32,9], index: 4, kind: input, shape index: {}]   ;;  %s3343_s5 = inlined_call_operand.vmem [shape: f32[32,1], index: 5, kind: input, shape index: {}]   ;;  %s3344_s6 = inlined_call_operand.vmem [shape: f32[32,1], index: 6, kind: input, shape index: {}]   ;;  %s3345_s7 = inlined_call_operand.vmem [shape: f32[4,512], index: 7, kind: input, shape index: {}]   ;;  %s3346_s8 = inlined_call_operand.vmem [shape: bf16[16,32], index: 8, kind: input, shape index: {}]   ;;  %s3347_s9 = inlined_call_operand.vmem [shape: f32[16,1], index: 9, kind: input, shape index: {}]   ;;  %s3348_s10 = inlined_call_operand.hbm [shape: f32[4,16,256], index: 10, kind: output, shape index: {}]  }
   0x1   :  { %17 = vsyncpa [#allocation3 + $0x1], 0  ;;  %s2123_s13 = smov 0   ;;  %s2125_s14 = smov 0  }
   0x2   :  { %s2127_s15 = smov 0   ;;  %s2129_s16 = smov 0  }
   0x3 LB: > { %s2144_s17 = sadd.s32 4294967295, %s2051_s16   ;;  %s1867_s18 = sadd.s32 4294967294, %s2051_s16   ;;  %s2051_s16 = sphi %s2129_s16, %s3489_s16   ;;  %s2047_s15 = sphi %s2127_s15, %s3488_s15   ;;  %s2043_s14 = sphi %s2125_s14, %s3487_s14   ;;  %s2039_s13 = sphi %s2123_s13, %s3486_s13  }
   0x4   : > { %s2148_s19 = sadd.s32 1, %s2051_s16   ;;  %s245_s20 = sadd.s32 1, %s2047_s15 }
   0x5   : > { %s242_s21 = ssub.s32 %s2051_s16, %s2148_s19  ;;  %p255_p0 = scmp.ne.s32.totalorder %s2047_s15, %s2043_s14 }
   0x6   : > { %p243_p1 = scmp.eq.s32.totalorder %s242_s21, 0  ;;  %p256_p2 = scmp.eq.s32.totalorder %s2144_s17, 1 }
   0x7   : > { %p261_p3 = scmp.ne.s32.totalorder %s2043_s14, %s2039_s13  ;;  %p262_p4 = scmp.eq.s32.totalorder %s1867_s18, 1 }
   0x8   : > { %s2159_s22 = scalar_select %p243_p1, %s2047_s15, %s245_s20  }
   0x9   : > { %p2161_p5 = por %p256_p2, %p255_p0  ;;  %p2165_p6 = por %p262_p4, %p261_p3 }
   0xa   : > { %p1870_p7 = scmp.ge.s32.totalorder %s2051_s16, 1  ;;  %p317_p8 = scmp.lt.s32.totalorder %s2051_s16, 3 }
   0xc   : > { %p318_p9 = pnand %p1870_p7, %p317_p8 }
   0xe   : > { %321 = sbr.rel (%p318_p9) target bundleno = 786 (0x312), region = 60 }
  0x13   : > { %v547_v0 = vld [vmem:[%s3341_s3 + $0x10] sm:$0xff]  ;;  %v2053_v2 = vmov 0   ;;  %v2054_v3 = vmov 3   ;;  %s1872_s29 = sshll.u32 %s2144_s17, 1  ;;  %v548_v4 = vld [vmem:[%s3341_s3 + $0x18] sm:$0xff]  ;;  %v2055_v6 = vmov 6  }
  0x14   : > { %v2177_v1 = vld [vmem:[%s3342_s4 + $0x10] sm:$0xff]  ;;  %1954 = vset.pattern.permute.xlu1 %v2053_v2  ;;  %1955 = vset.pattern.permute.xlu0 %v2054_v3  ;;  %p357_p10 = scmp.lt.s32.totalorder %s1872_s29, 3  ;;  %v2191_v5 = vld [vmem:[%s3342_s4 + $0x18] sm:$0xff]  ;;  %v383_v7 = vld [vmem:[%s3340_s2 + $0x8] sm:$0xff]  ;;  %vm416_vm0 = vcmask 130048   ;;  %v2056_v23 = vmov 5  }
  0x15   : > { %561 = vperm.xlu1 %1954, %v547_v0   ;;  %903 = vperm.xlu0 %1955, %v2177_v1   ;;  %v2206_v8 = vld [vmem:[%s3342_s4 + $0x8] sm:$0xff]  ;;  %v1980_v22 = vld [vmem:[%s3339_s1] sm:$0xff]   ;;  %v2057_v26 = vmov 8   ;;  %v2058_v27 = vmov 2   ;;  %v2059_v28 = vmov 4   ;;  %v2060_v29 = vmov 7  }
  0x16   : > { %455 = vmatprep.mubr.bf16.mxu0 %v2053_v2  ;;  %508 = vmatprep.mubr.bf16.mxu1 %v2053_v2  ;;  %s3491_s29 = smov (!%p357_p10, %s1872_s29), 3  ;;  %v546_v21 = vld [vmem:[%s3341_s3 + $0x8] sm:$0xff]  ;;  %v2231_v24 = vld [vmem:[%s3342_s4] sm:$0xff]  ;;  %v384_v30 = vld [vmem:[%s3340_s2 + $0x10] sm:$0xff]  ;;  %v2061_v34 = vmov 1   ;;  %s3349_s26 = smov 16  }
  0x17   : > { %s1898_s20 = sshll.u32 %s3491_s29, 5  ;;  %v1981_v25 = vld [vmem:[%s3339_s1 + $0x8] sm:$0xff]   ;;  %v385_v31 = vld [vmem:[%s3340_s2 + $0x18] sm:$0xff]  ;;  %v382_v32 = vld [vmem:[%s3340_s2] sm:$0xff]  ;;  %s2063_s27 = smov 112  }
  0x18   : > { %s2201_s28 = scalar_lea.vmem %s3338_s0, %s1898_s20  ;;  %v545_v33 = vld [vmem:[%s3341_s3] sm:$0xff]  ;;  %s2064_s20 = smov 1  }
  0x19   : > { %566 = vperm.xlu1 %1954, %v548_v4   ;;  %1958 = vset.pattern.permute.xlu0 %v2055_v6  ;;  %v366_v9 = vld [vmem:[%s2201_s28 + $0x8] sm:$0xff]  ;;  %v368_v10 = vld [vmem:[%s2201_s28 + $0x18] sm:$0xff]  ;;  %v365_v14 = vld [vmem:[%s2201_s28] sm:$0xff]  ;;  %s2065_s21 = smov 127   ;;  %s353_s25 = sand.u32 1, %s2043_s14  }
  0x1a   : > { %955 = vperm.xlu0 %1958, %v2191_v5   ;;  %v1876_v11 = vld [vmem:[%s2201_s28 + $0x28] sm:$0xff]  ;;  %v379_v12 = vpack.c.bf16 %v368_v10, %v366_v9  ;;  %v1878_v13 = vld [vmem:[%s2201_s28 + $0x38] sm:$0xff]  ;;  %v367_v15 = vld [vmem:[%s2201_s28 + $0x10] sm:$0xff]  ;;  %s1871_s30 = sshll.u32 %s353_s25, 6 }
  0x1b   : > { %v381_v16 = vpack.c.bf16 %v1878_v13, %v1876_v11  ;;  %v378_v17 = vpack.c.bf16 %v367_v15, %v365_v14  ;;  %v1875_v18 = vld [vmem:[%s2201_s28 + $0x20] sm:$0xff]  ;;  %v1877_v19 = vld [vmem:[%s2201_s28 + $0x30] sm:$0xff]  ;;  %s355_s11 = scalar_lea.vmem [#allocation2], %s1871_s30 }
  0x1c   : > { %437 = vmatprep.subr.bf16.mxu0 %v379_v12  ;;  %v380_v20 = vpack.c.bf16 %v1877_v19, %v1875_v18  ;;  %s1805_s29 = sshll.u32 %s355_s11, 4  ;;  %s3293_s29 = int_to_ptr.vmem [resolvable:$true] %s1805_s29 }
  0x1d   : > { %393 = vperm.xlu1 %1954, %v383_v7   ;;  %490 = vmatprep.subr.bf16.mxu1 %v381_v16 }
  0x1e   : > { %947 = vperm.xlu0 %1958, %v2206_v8   ;;  %438 = vmatpush1.bf16.msra.mxu0 %v378_v17 }
  0x1f   : > { %491 = vmatpush1.bf16.msra.mxu1 %v380_v20 }
  0x21   : > { %556 = vperm.xlu1 %1954, %v546_v21   ;;  %1881 = vmatmul.mubr.msk.bf16.vlgmr.msra.gmra.mxu0 %vm416_vm0, %v1980_v22 }
  0x22   : > { %1965 = vset.pattern.permute.xlu0 %v2056_v23  ;;  %1883 = vmatmul.mubr.msk.bf16.vlgmr.msra.gmra.mxu1 %vm416_vm0, %v1980_v22 }
  0x23   : > { %1159 = vperm.xlu0 %1965, %v2177_v1   ;;  %465 = vmatprep.mubr.bf16.mxu0 %v2053_v2 }
  0x24   : > { %518 = vmatprep.mubr.bf16.mxu1 %v2053_v2 }
  0x25   : > { %875 = vperm.xlu1 %1954, %v2191_v5  }
  0x27   : > { %1151 = vperm.xlu0 %1965, %v2231_v24  }
  0x29   : > { %1956 = vset.pattern.permute.xlu1 %v2054_v3  ;;  %1882 = vmatmul.mubr.msk.bf16.gmra.mxu0 %vm416_vm0, %v1981_v25 }
  0x2a   : > { %907 = vperm.xlu1 %1956, %v2191_v5   ;;  %1884 = vmatmul.mubr.msk.bf16.gmra.mxu1 %vm416_vm0, %v1981_v25 }
  0x2b   : > { %1967 = vset.pattern.permute.xlu0 %v2057_v26  ;;  %1719 = vmatprep.mubr.bf16.mxu0 %v2053_v2 }
  0x2c   : > { %1207 = vperm.xlu0 %1967, %v2177_v1   ;;  %1762 = vmatprep.mubr.bf16.mxu1 %v2053_v2 }
  0x2e   : > { %1957 = vset.pattern.permute.xlu1 %v2055_v6 }
  0x2f   : > { %951 = vperm.xlu1 %1957, %v2177_v1  }
  0x30   : > { %1203 = vperm.xlu0 %1967, %v2206_v8  }
  0x33   : > { %1959 = vset.pattern.permute.xlu1 %v2058_v27 }
  0x34   : > { %1127 = vperm.xlu1 %1959, %v2177_v1   ;;  %1971 = vset.pattern.permute.xlu0 %v2059_v28 }
  0x35   : > { %1031 = vperm.xlu0 %1971, %v2177_v1  }
  0x38   : > { %1131 = vperm.xlu1 %1959, %v2191_v5  }
  0x39   : > { %1023 = vperm.xlu0 %1971, %v2231_v24  }
  0x3c   : > { %1960 = vset.pattern.permute.xlu1 %v2056_v23 }
  0x3d   : > { %1163 = vperm.xlu1 %1960, %v2191_v5   ;;  %1975 = vset.pattern.permute.xlu0 %v2060_v29 }
  0x3e   : > { %1083 = vperm.xlu0 %1975, %v2191_v5  }
  0x41   : > { %1961 = vset.pattern.permute.xlu1 %v2053_v2 }
  0x42   : > { %860 = vperm.xlu1 %1961, %v2231_v24   ;;  %1075 = vperm.xlu0 %1975, %v2206_v8  }
  0x46   : > { %1962 = vset.pattern.permute.xlu1 %v2054_v3  ;;  %1978 = vset.pattern.permute.xlu0 %v2053_v2 }
  0x47   : > { %895 = vperm.xlu1 %1962, %v2231_v24   ;;  %398 = vperm.xlu0 %1978, %v384_v30  }
  0x4b   : > { %899 = vperm.xlu1 %1962, %v2206_v8   ;;  %403 = vperm.xlu0 %1978, %v385_v31  }
  0x4f   : > { %1963 = vset.pattern.permute.xlu1 %v2057_v26  ;;  %388 = vperm.xlu0 %1978, %v382_v32  }
  0x50   : > { %1211 = vperm.xlu1 %1963, %v2191_v5  }
  0x53   : > { %551 = vperm.xlu0 %1978, %v545_v33  }
  0x54   : > { %1964 = vset.pattern.permute.xlu1 %v2055_v6 }
  0x55   : > { %943 = vperm.xlu1 %1964, %v2231_v24  }
  0x57   : > { %870 = vperm.xlu0 %1978, %v2177_v1  }
  0x59   : > { %1966 = vset.pattern.permute.xlu1 %v2058_v27 }
  0x5a   : > { %1119 = vperm.xlu1 %1966, %v2231_v24  }
  0x5b   : > { %865 = vperm.xlu0 %1978, %v2206_v8  }
  0x5e   : > { %1123 = vperm.xlu1 %1966, %v2206_v8  }
  0x62   : > { %1968 = vset.pattern.permute.xlu1 %v2056_v23 }
  0x63   : > { %1155 = vperm.xlu1 %1968, %v2206_v8  }
  0x67   : > { %1969 = vset.pattern.permute.xlu1 %v2057_v26 }
  0x68   : > { %1199 = vperm.xlu1 %1969, %v2231_v24  }
  0x6c   : > { %1970 = vset.pattern.permute.xlu1 %v2061_v34 }
  0x6d   : > { %999 = vperm.xlu1 %1970, %v2177_v1  }
  0x71   : > { %1003 = vperm.xlu1 %1970, %v2191_v5  }
  0x75   : > { %1972 = vset.pattern.permute.xlu1 %v2059_v28 }
  0x76   : > { %1035 = vperm.xlu1 %1972, %v2191_v5  }
  0x7a   : > { %1973 = vset.pattern.permute.xlu1 %v2060_v29 }
  0x7b   : > { %1079 = vperm.xlu1 %1973, %v2177_v1  }
  0x7f   : > { %1974 = vset.pattern.permute.xlu1 %v2061_v34 }
  0x80   : > { %991 = vperm.xlu1 %1974, %v2231_v24  }
  0x84   : > { %995 = vperm.xlu1 %1974, %v2206_v8  }
  0x88   : > { %1976 = vset.pattern.permute.xlu1 %v2059_v28 }
  0x89   : > { %1027 = vperm.xlu1 %1976, %v2206_v8  }
  0x8d   : > { %1977 = vset.pattern.permute.xlu1 %v2060_v29 }
  0x8e   : > { %1071 = vperm.xlu1 %1977, %v2231_v24  }
  0x90   : > { %v2290_v35 = vpop.permute.xlu0 %903  ;;  %v2292_v36 = vpop.permute.xlu1 %561 }
  0x92   : > { %1979 = vset.pattern.permute.xlu1 %v2053_v2 }
  0x94   : > { %v2295_v37 = vpop.permute.xlu1 %566 }
  0x95   : > { %v2297_v38 = vpop.permute.xlu0 %955 }
  0x96   : > { %3389 = vst [vmem:[#allocation5_spill] sm:$0xff] %v2297_v38 }
  0x98   : > { %v2299_v39 = vpop.permute.xlu1 %393 }
  0x99   : > { %v2301_v40 = vpop.permute.xlu0 %947 }
  0x9c   : > { %v2303_v41 = vpop.permute.xlu1 %556 }
  0x9e   : > { %v2307_v43 = vpop.permute.xlu0 %1159 }
  0xa0   : > { %v2305_v42 = vpop.permute.xlu1 %875 }
  0xa1   : > { %3390 = vst [vmem:[#allocation6_spill] sm:$0xff] %v2305_v42 }
  0xa2   : > { %v2311_v45 = vpop.permute.xlu0 %1151 }
  0xa5   : > { %v2309_v44 = vpop.permute.xlu1 %907 }
  0xa7   : > { %v2315_v47 = vpop.permute.xlu0 %1207 }
  0xa8   : > { %3392 = vst [vmem:[#allocation8_spill] sm:$0xff] %v2315_v47 }
  0xaa   : > { %v2313_v46 = vpop.permute.xlu1 %951 }
  0xab   : > { %3391 = vst [vmem:[#allocation7_spill] sm:$0xff] %v2313_v46  ;;  %v2321_v50 = vpop.permute.xlu0 %1203 }
  0xac   : > { %3395 = vst [vmem:[#allocation11_spill] sm:$0xff] %v2321_v50 }
  0xaf   : > { %v2317_v48 = vpop.permute.xlu1 %1127 }
  0xb0   : > { %3393 = vst [vmem:[#allocation9_spill] sm:$0xff] %v2317_v48  ;;  %v2325_v52 = vpop.permute.xlu0 %1031 }
  0xb1   : > { %3397 = vst [vmem:[#allocation13_spill] sm:$0xff] %v2325_v52 }
  0xb3   : > { %v2319_v49 = vpop.permute.xlu1 %1131 }
  0xb4   : > { %3394 = vst [vmem:[#allocation10_spill] sm:$0xff] %v2319_v49  ;;  %v2329_v54 = vpop.permute.xlu0 %1023 }
  0xb8   : > { %v2323_v51 = vpop.permute.xlu1 %1163 }
  0xb9   : > { %3396 = vst [vmem:[#allocation12_spill] sm:$0xff] %v2323_v51  ;;  %v2333_v56 = vpop.permute.xlu0 %1083 }
  0xba   : > { %3398 = vst [vmem:[#allocation14_spill] sm:$0xff] %v2333_v56 }
  0xbd   : > { %v2327_v53 = vpop.permute.xlu1 %860  ;;  %v2339_v59 = vpop.permute.xlu0 %1075 }
  0xbe   : > { %3400 = vst [vmem:[#allocation16_spill] sm:$0xff] %v2339_v59 }
  0xc2   : > { %v2331_v55 = vpop.permute.xlu1 %895  ;;  %v2343_v61 = vpop.permute.xlu0 %398 }
  0xc6   : > { %v2335_v57 = vpop.permute.xlu1 %899  ;;  %v2347_v63 = vpop.permute.xlu0 %403 }
  0xca   : > { %v389_v1 = vpop.permute.xlu0 %388 }
  0xcb   : > { %v2337_v58 = vpop.permute.xlu1 %1211 }
  0xcc   : > { %3399 = vst [vmem:[#allocation15_spill] sm:$0xff] %v2337_v58 }
  0xce   : > { %v552_v7 = vpop.permute.xlu0 %551 }
  0xd0   : > { %v2341_v60 = vpop.permute.xlu1 %943 }
  0xd5   : > { %v2345_v62 = vpop.permute.xlu1 %1119 }
  0xd9   : > { %v2349_v0 = vpop.permute.xlu1 %1123 }
  0xda   : > { %3401 = vst [vmem:[#allocation17_spill] sm:$0xff] %v2349_v0 }
  0xde   : > { %v2351_v2 = vpop.permute.xlu1 %1155 }
  0xe1   : > { %v457_v3 = vpop.f32.mrf.mxu0 }
  0xe2   : > { %v458_v4 = vadd.f32 %v457_v3, %v389_v1  ;;  %v510_v5 = vpop.f32.mrf.mxu1 }
  0xe3   : > { %v2353_v6 = vpop.permute.xlu1 %1199  ;;  %v511_v8 = vadd.f32 %v510_v5, %v389_v1  ;;  %v459_v9 = vpop.f32.mrf.mxu0 }
  0xe4   : > { %vm529_vm1 = vcmp.gt.f32.partialorder %v458_v4, 0.0  ;;  %v569_v10 = vmul.f32 %v552_v7, %v458_v4  ;;  %v460_v11 = vadd.f32 %v459_v9, %v389_v1  ;;  %v512_v12 = vpop.f32.mrf.mxu1 }
  0xe5   : > { %v513_v13 = vadd.f32 %v512_v12, %v389_v1  ;;  %v461_v14 = vpop.f32.mrf.mxu0  ;;  %v571_v16 = vmul.f32 %v552_v7, %v511_v8  ;;  %vm531_vm3 = vcmp.gt.f32.partialorder %v511_v8, 0.0 }
  0xe6   : > { %v2355_v15 = vsel %vm529_vm1, %v458_v4, %v569_v10  ;;  %vm530_vm2 = vcmp.gt.f32.partialorder %v460_v11, 0.0  ;;  %v570_v17 = vmul.f32 %v552_v7, %v460_v11  ;;  %v514_v18 = vpop.f32.mrf.mxu1  ;;  %v462_v26 = vadd.f32 %v461_v14, %v2299_v39 }
  0xe7   : > { %v463_v19 = vpop.f32.mrf.mxu0  ;;  %619 = vrot.lane.b32.xlu1 %v2355_v15, %s3349_s26  ;;  %v572_v22 = vmul.f32 %v552_v7, %v513_v13  ;;  %vm532_vm4 = vcmp.gt.f32.partialorder %v513_v13, 0.0  ;;  %v2367_v25 = vsel %vm531_vm3, %v511_v8, %v571_v16  ;;  %v515_v28 = vadd.f32 %v514_v18, %v2299_v39 }
  0xe8   : > { %v2359_v20 = vpop.permute.xlu1 %999  ;;  %v2361_v21 = vsel %vm530_vm2, %v460_v11, %v570_v17  ;;  %v516_v23 = vpop.f32.mrf.mxu1  ;;  %v573_v34 = vmul.f32 %v2303_v41, %v462_v26  ;;  %vm533_vm5 = vcmp.gt.f32.partialorder %v462_v26, 0.0  ;;  %v464_v4 = vadd.f32 %v463_v19, %v2299_v39 }
  0xe9   : > { %3402 = vst [vmem:[#allocation18_spill] sm:$0xff] %v2359_v20  ;;  %v2363_v24 = vpop.f32.mrf.mxu0  ;;  %621 = vrot.lane.b32.xlu0 %v2361_v21, %s3349_s26  ;;  %v2377_v31 = vsel %vm532_vm4, %v513_v13, %v572_v22  ;;  %vm535_vm6 = vcmp.gt.f32.partialorder %v515_v28, 0.0  ;;  %v575_v8 = vmul.f32 %v2303_v41, %v515_v28  ;;  %v517_v13 = vadd.f32 %v516_v23, %v2299_v39 }
  0xea   : > { %v2370_v27 = vpop.f32.mrf.mxu1  ;;  %v2398_v17 = vsel %vm533_vm5, %v462_v26, %v573_v34  ;;  %vm534_vm11 = vcmp.gt.f32.partialorder %v464_v4, 0.0  ;;  %vm769_vm2 = vcmask 916480   ;;  %v1039_v59 = vmul.f32 %v2329_v54, %v2361_v21 }
  0xeb   : > { %v469_v29 = vpop.f32.mrf.mxu0  ;;  %623 = vrot.lane.b32.xlu1 %v2367_v25, %s3349_s26  ;;  %v2418_v34 = vsel %vm535_vm6, %v515_v28, %v575_v8  ;;  %vm536_vm12 = vcmp.gt.f32.partialorder %v517_v13, 0.0  ;;  %v2435_v28 = vmul.f32 %v2351_v2, %v2398_v17  ;;  %vm1443_vm3 = vcmask 1039360  }
  0xec   : > { %v2375_v30 = vpop.permute.xlu1 %1003  ;;  %v2379_v32 = vpop.f32.mrf.mxu1  ;;  %v2443_v8 = vmul.f32 %v2351_v2, %v2418_v34 }
  0xed   : > { %3403 = vst [vmem:[#allocation19_spill] sm:$0xff] %v2375_v30  ;;  %v471_v33 = vpop.f32.mrf.mxu0  ;;  %625 = vrot.lane.b32.xlu0 %v2377_v31, %s3349_s26  ;;  %3412 = vst [vmem:[#allocation28_spill] sm:$0xff] %v2435_v28 }
  0xee   : > { %v472_v1 = vadd.f32 %v471_v33, %v2347_v63  ;;  %v524_v3 = vpop.f32.mrf.mxu1  ;;  %3413 = vst [vmem:[#allocation29_spill] sm:$0xff] %v2443_v8 }
  0xef   : > { %v525_v5 = vadd.f32 %v524_v3, %v2347_v63  ;;  %v473_v7 = vpop.f32.mrf.mxu0  ;;  %737 = vrot.lane.b32.xlu1 %v2355_v15, %s2063_s27 }
  0xf0   : > { %vm541_vm7 = vcmp.gt.f32.partialorder %v472_v1, 0.0  ;;  %v581_v9 = vmul.f32 %v2295_v37, %v472_v1  ;;  %v474_v10 = vadd.f32 %v473_v7, %v2347_v63  ;;  %v526_v11 = vpop.f32.mrf.mxu1 }
  0xf1   : > { %v1036_v12 = vpop.permute.xlu1 %1035  ;;  %vm543_vm8 = vcmp.gt.f32.partialorder %v525_v5, 0.0  ;;  %v583_v14 = vmul.f32 %v2295_v37, %v525_v5  ;;  %v527_v16 = vadd.f32 %v526_v11, %v2347_v63  ;;  %739 = vrot.lane.b32.xlu0 %v2361_v21, %s2063_s27  ;;  %v574_v63 = vmul.f32 %v2303_v41, %v464_v4 }
  0xf2   : > { %v2400_v18 = vsel %vm541_vm7, %v472_v1, %v581_v9  ;;  %vm542_vm9 = vcmp.gt.f32.partialorder %v474_v10, 0.0  ;;  %v582_v19 = vmul.f32 %v2295_v37, %v474_v10  ;;  %v576_v1 = vmul.f32 %v2303_v41, %v517_v13 }
  0xf3   : > { %3404 = vst [vmem:[#allocation20_spill] sm:$0xff] %v2400_v18  ;;  %v2403_v22 = vsel %vm543_vm8, %v525_v5, %v583_v14  ;;  %vm544_vm10 = vcmp.gt.f32.partialorder %v527_v16, 0.0  ;;  %v584_v39 = vmul.f32 %v2295_v37, %v527_v16  ;;  %v2407_v23 = vmul.f32 %v1036_v12, %v2400_v18  ;;  %741 = vrot.lane.b32.xlu1 %v2367_v25, %s2063_s27 }
  0xf4   : > { %3405 = vst [vmem:[#allocation21_spill] sm:$0xff] %v2403_v22  ;;  %v2412_v26 = vsel %vm542_vm9, %v474_v10, %v582_v19  ;;  %v2415_v33 = vmul.f32 %v1036_v12, %v2403_v22  ;;  %v2439_v41 = vsel %vm534_vm11, %v464_v4, %v574_v63  ;;  %v2445_v9 = vsel %vm536_vm12, %v517_v13, %v576_v1 }
  0xf5   : > { %3406 = vst [vmem:[#allocation22_spill] sm:$0xff] %v2407_v23  ;;  %v2421_v37 = vsel %vm544_vm10, %v527_v16, %v584_v39  ;;  %v2424_v3 = vmul.f32 %v1036_v12, %v2412_v26  ;;  %743 = vrot.lane.b32.xlu0 %v2377_v31, %s2063_s27  ;;  %v2455_v11 = vmul.f32 %v2351_v2, %v2439_v41 }
  0xf6   : > { %3407 = vst [vmem:[#allocation23_spill] sm:$0xff] %v2415_v33  ;;  %3408 = vst [vmem:[#allocation24_spill] sm:$0xff] %v2421_v37  ;;  %v2428_v5 = vpop.permute.xlu1 %1079  ;;  %v2431_v7 = vmul.f32 %v1036_v12, %v2421_v37  ;;  %v2459_v4 = vmul.f32 %v2351_v2, %v2445_v9  ;;  %v468_v12 = vadd.f32 %v2363_v24, %v2343_v61 }
  0xf7   : > { %3409 = vst [vmem:[#allocation25_spill] sm:$0xff] %v2424_v3  ;;  %3410 = vst [vmem:[#allocation26_spill] sm:$0xff] %v2428_v5  ;;  %627 = vrot.lane.b32.xlu1 %v2398_v17, %s3349_s26  ;;  %v470_v14 = vadd.f32 %v469_v29, %v2343_v61  ;;  %v521_v2 = vadd.f32 %v2370_v27, %v2343_v61  ;;  %v523_v24 = vadd.f32 %v2379_v32, %v2343_v61 }
  0xf8   : > { %3411 = vst [vmem:[#allocation27_spill] sm:$0xff] %v2431_v7  ;;  %3414 = vst [vmem:[#allocation30_spill] sm:$0xff] %v2455_v11  ;;  %v577_v16 = vmul.f32 %v2292_v36, %v468_v12  ;;  %vm537_vm13 = vcmp.gt.f32.partialorder %v468_v12, 0.0 }
  0xf9   : > { %629 = vrot.lane.b32.xlu0 %v2439_v41, %s3349_s26  ;;  %3415 = vst [vmem:[#allocation31_spill] sm:$0xff] %v2459_v4  ;;  %v578_v19 = vmul.f32 %v2292_v36, %v470_v14  ;;  %vm538_vm14 = vcmp.gt.f32.partialorder %v470_v14, 0.0  ;;  %v579_v32 = vmul.f32 %v2292_v36, %v521_v2  ;;  %vm539_vm15 = vcmp.gt.f32.partialorder %v521_v2, 0.0 }
  0xfa   : > { %v2494_v61 = vsel %vm537_vm13, %v468_v12, %v577_v16  ;;  %v580_v7 = vmul.f32 %v2292_v36, %v523_v24  ;;  %vm540_vm1 = vcmp.gt.f32.partialorder %v523_v24, 0.0  ;;  %v1547_v36 = vld [vmem:[%s3343_s5 + $0x18] sm:$0xff] }
  0xfb   : > { %v2449_v10 = vpop.permute.xlu1 %991  ;;  %631 = vrot.lane.b32.xlu1 %v2418_v34, %s3349_s26  ;;  %v2499_v28 = vsel %vm538_vm14, %v470_v14, %v578_v19  ;;  %v1602_v14 = vld [vmem:[%s3344_s6 + $0x10] sm:$0xff]  ;;  %v1603_v16 = vld [vmem:[%s3344_s6 + $0x18] sm:$0xff]  ;;  %v1545_v19 = vld [vmem:[%s3343_s5 + $0x8] sm:$0xff] }
  0xfc   : > { %v2508_v12 = vsel %vm540_vm1, %v523_v24, %v580_v7  ;;  %v1546_v7 = vld [vmem:[%s3343_s5 + $0x10] sm:$0xff]  ;;  %v685_v24 = vlaneseq }
  0xfd   : > { %633 = vrot.lane.b32.xlu0 %v2445_v9, %s3349_s26 }
  0xff   : > { %v2465_v13 = vpop.permute.xlu1 %995  ;;  %745 = vrot.lane.b32.xlu1 %v2398_v17, %s2063_s27 }
 0x100   : > { %3416 = vst [vmem:[#allocation32_spill] sm:$0xff] %v2465_v13 }
 0x101   : > { %747 = vrot.lane.b32.xlu0 %v2439_v41, %s2063_s27 }
 0x103   : > { %749 = vrot.lane.b32.xlu1 %v2418_v34, %s2063_s27 }
 0x104   : > { %v1028_v29 = vpop.permute.xlu1 %1027 }
 0x105   : > { %v2481_v39 = vmul.f32 %v1028_v29, %v2398_v17  ;;  %v2484_v63 = vmul.f32 %v1028_v29, %v2439_v41  ;;  %v2487_v1 = vmul.f32 %v1028_v29, %v2418_v34  ;;  %v2490_v27 = vmul.f32 %v1028_v29, %v2445_v9  ;;  %751 = vrot.lane.b32.xlu0 %v2445_v9, %s2063_s27 }
 0x106   : > { %v2504_v29 = vsel %vm539_vm15, %v521_v2, %v579_v32  ;;  %v1544_v2 = vld [vmem:[%s3343_s5] sm:$0xff]  ;;  %v2554_v32 = vshrl.u32 %v685_v24, 7 }
 0x107   : > { %3417 = vst [vmem:[#allocation33_spill] sm:$0xff] %v2481_v39  ;;  %3418 = vst [vmem:[#allocation34_spill] sm:$0xff] %v2484_v63  ;;  %635 = vrot.lane.b32.xlu1 %v2494_v61, %s3349_s26 }
 0x108   : > { %3419 = vst [vmem:[#allocation35_spill] sm:$0xff] %v2487_v1  ;;  %3420 = vst [vmem:[#allocation36_spill] sm:$0xff] %v2490_v27  ;;  %v804_v49 = vsub.s32 1, %v2554_v32  ;;  %v808_v47 = vsub.s32 5, %v2554_v32 }
 0x109   : > { %637 = vrot.lane.b32.xlu0 %v2499_v28, %s3349_s26  ;;  %3421 = vst [vmem:[#allocation37_spill] sm:$0xff] %v2554_v32  ;;  %v2565_v33 = vpop.permute.xlu1 %1071 }
 0x10b   : > { %639 = vrot.lane.b32.xlu1 %v2504_v29, %s3349_s26 }
 0x10d   : > { %641 = vrot.lane.b32.xlu0 %v2508_v12, %s3349_s26 }
 0x10f   : > { %753 = vrot.lane.b32.xlu1 %v2494_v61, %s2063_s27 }
 0x111   : > { %755 = vrot.lane.b32.xlu0 %v2499_v28, %s2063_s27 }
 0x113   : > { %757 = vrot.lane.b32.xlu1 %v2504_v29, %s2063_s27 }
 0x115   : > { %759 = vrot.lane.b32.xlu0 %v2508_v12, %s2063_s27 }
 0x117   : > { %643 = vrot.lane.b32.xlu1 %v2400_v18, %s3349_s26 }
 0x119   : > { %645 = vrot.lane.b32.xlu0 %v2412_v26, %s3349_s26 }
 0x11b   : > { %647 = vrot.lane.b32.xlu1 %v2403_v22, %s3349_s26 }
 0x11d   : > { %649 = vrot.lane.b32.xlu0 %v2421_v37, %s3349_s26 }
 0x11f   : > { %761 = vrot.lane.b32.xlu1 %v2400_v18, %s2063_s27 }
 0x121   : > { %763 = vrot.lane.b32.xlu0 %v2412_v26, %s2063_s27 }
 0x123   : > { %765 = vrot.lane.b32.xlu1 %v2403_v22, %s2063_s27 }
 0x125   : > { %767 = vrot.lane.b32.xlu0 %v2421_v37, %s2063_s27  ;;  %s1900_s27 = sshll.u32 %s2144_s17, 10  ;;  %s3297_s17 = scalar_lea.sflag [#allocation3], %s353_s25 }
 0x126   : > { %s3289_s18 = scalar_lea.hbm %s3348_s10, %s1900_s27 }
 0x127   : > { %1565 = vperm.xlu1 %1979, %v1547_v36   ;;  %v687_v36 = vsub.s32 0, %v2554_v32 }
 0x129   : > { %1560 = vperm.xlu0 %1978, %v1546_v7   ;;  %v2560_v7 = vld [vmem:[%s3345_s7] sm:$0xff] }
 0x12a   : > { %3422 = vst [vmem:[#allocation38_spill] sm:$0xff] %v2560_v7  ;;  %v688_v3 = vrot.slane %v2560_v7, %v687_v36 }
 0x12b   : > { %1616 = vperm.xlu1 %1979, %v1602_v14   ;;  %v2562_v14 = vpop.permute.xlu0 %870 }
 0x12c   : > { %3423 = vst [vmem:[#allocation39_spill] sm:$0xff] %v2562_v14  ;;  %v2576_v23 = vrot.slane %v688_v3, %v687_v36  ;;  %v1166_v3 = vmul.f32 %v2311_v45, %v2355_v15 }
 0x12d   : > { %1621 = vperm.xlu0 %1978, %v1603_v16   ;;  %v691_v16 = vsub.s32 4, %v2554_v32  ;;  %v2600_v32 = vmul.f32 %v2311_v45, %v2377_v31 }
 0x12f   : > { %1550 = vperm.xlu1 %1979, %v1544_v2   ;;  %v2571_v2 = vld [vmem:[%s3345_s7 + $0x8] sm:$0xff]  ;;  %v2574_v24 = vpop.permute.xlu0 %865 }
 0x130   : > { %3424 = vst [vmem:[#allocation40_spill] sm:$0xff] %v2571_v2  ;;  %v696_v58 = vrot.slane %v2571_v2, %v687_v36  ;;  %v700_v56 = vrot.slane %v2571_v2, %v691_v16  ;;  %v817_v11 = vrot.slane %v2571_v2, %v808_v47 }
 0x131   : > { %1555 = vperm.xlu0 %1978, %v1545_v19   ;;  %v692_v19 = vrot.slane %v2560_v7, %v691_v16 }
 0x132   : > { %v2585_v5 = vrot.slane %v696_v58, %v687_v36  ;;  %v2591_v16 = vrot.slane %v700_v56, %v687_v36  ;;  %v805_v58 = vrot.slane %v2560_v7, %v804_v49  ;;  %v1038_v56 = vmul.f32 %v2329_v54, %v2355_v15 }
 0x133   : > { %v2580_v27 = vrot.slane %v692_v19, %v687_v36 }
 0x159   : > { %v620_v38 = vpop.permute.xlu1 %619 }
 0x15a   : > { %v679_v30 = vsel %vm416_vm0, 0.0, %v620_v38 }
 0x15b   : > { %v721_v1 = vmul.f32 %v2576_v23, %v679_v30  ;;  %v622_v42 = vpop.permute.xlu0 %621 }
 0x15c   : > { %v651_v63 = vsel %vm416_vm0, %v620_v38, %v622_v42  ;;  %v813_v38 = vrot.slane %v2571_v2, %v804_v49  ;;  %v912_v2 = vmul.f32 %v2331_v55, %v2367_v25 }
 0x15d   : > { %v1006_v19 = vmul.f32 %v2449_v10, %v721_v1  ;;  %v1134_v39 = vmul.f32 %v2345_v62, %v721_v1  ;;  %v722_v46 = vmul.f32 %v2580_v27, %v651_v63  ;;  %v624_v30 = vpop.permute.xlu1 %623  ;;  %v809_v63 = vrot.slane %v2560_v7, %v808_v47 }
 0x15e   : > { %v652_v48 = vsel %vm416_vm0, %v622_v42, %v624_v30  ;;  %v2621_v7 = vmul.f32 %v2335_v57, %v2398_v17  ;;  %v910_v47 = vmul.f32 %v2331_v55, %v2355_v15  ;;  %v2635_v17 = vrot.slane %v813_v38, %v804_v49 }
 0x15f   : > { %v1182_v36 = vadd.f32 %v1166_v3, %v1134_v39  ;;  %v1007_v20 = vmul.f32 %v2449_v10, %v722_v46  ;;  %v626_v14 = vpop.permute.xlu0 %625  ;;  %v723_v42 = vmul.f32 %v2585_v5, %v652_v48  ;;  %v2612_v8 = vadd.f32 %v1038_v56, %v1006_v19 }
 0x160   : > { %v653_v4 = vsel %vm416_vm0, %v624_v30, %v626_v14  ;;  %v2617_v3 = vrot.slane %v805_v58, %v804_v49  ;;  %v878_v48 = vmul.f32 %v2327_v53, %v721_v1  ;;  %v2633_v58 = vrot.slane %v809_v63, %v804_v49 }
 0x161   : > { %v2615_v13 = vmul.f32 %v2591_v16, %v653_v4  ;;  %v738_v39 = vpop.permute.xlu1 %737  ;;  %v2623_v50 = vadd.f32 %v1039_v59, %v1007_v20  ;;  %v1008_v14 = vmul.f32 %v2449_v10, %v723_v42  ;;  %v911_v4 = vmul.f32 %v2331_v55, %v2361_v21 }
 0x162   : > { %3425 = vst [vmem:[#allocation41_spill] sm:$0xff] %v2633_v58  ;;  %v1040_v59 = vmul.f32 %v2329_v54, %v2367_v25  ;;  %v2640_v1 = vrot.slane %v817_v11, %v804_v49  ;;  %v2644_v15 = vmul.f32 %v2335_v57, %v2418_v34  ;;  %v1041_v56 = vmul.f32 %v2329_v54, %v2377_v31 }
 0x163   : > { %v1009_v19 = vmul.f32 %v2449_v10, %v2615_v13  ;;  %v740_v30 = vpop.permute.xlu0 %739  ;;  %v879_v10 = vmul.f32 %v2327_v53, %v722_v46  ;;  %v880_v49 = vmul.f32 %v2327_v53, %v723_v42 }
 0x164   : > { %v770_v20 = vsel %vm769_vm2, %v738_v39, %v740_v30  ;;  %3426 = vst [vmem:[#allocation42_spill] sm:$0xff] %v2644_v15  ;;  %v2652_v52 = vadd.f32 %v1040_v59, %v1008_v14  ;;  %v926_v39 = vadd.f32 %v910_v47, %v878_v48  ;;  %v913_v59 = vmul.f32 %v2331_v55, %v2377_v31 }
 0x165   : > { %v838_v63 = vmul.f32 %v2617_v3, %v770_v20  ;;  %v742_v38 = vpop.permute.xlu1 %741  ;;  %v2656_v34 = vadd.f32 %v1041_v56, %v1009_v19  ;;  %v1167_v48 = vmul.f32 %v2311_v45, %v2361_v21  ;;  %v1135_v55 = vmul.f32 %v2345_v62, %v722_v46 }
 0x166   : > { %v771_v11 = vsel %vm769_vm2, %v740_v30, %v742_v38  ;;  %v1168_v46 = vmul.f32 %v2311_v45, %v2367_v25 }
 0x167   : > { %v1086_v22 = vmul.f32 %v2565_v33, %v838_v63  ;;  %v1214_v54 = vmul.f32 %v2353_v6, %v838_v63  ;;  %v839_v0 = vmul.f32 %v2633_v58, %v771_v11  ;;  %v744_v20 = vpop.permute.xlu0 %743  ;;  %v958_v18 = vmul.f32 %v2341_v60, %v838_v63 }
 0x168   : > { %v772_v15 = vsel %vm769_vm2, %v742_v38, %v744_v20  ;;  %v798_v14 = vsel %vm769_vm2, %v744_v20, 0.0  ;;  %v881_v63 = vmul.f32 %v2327_v53, %v2615_v13  ;;  %v927_v38 = vadd.f32 %v911_v4, %v879_v10 }
 0x169   : > { %v1087_v47 = vmul.f32 %v2565_v33, %v839_v0  ;;  %v840_v19 = vmul.f32 %v2635_v17, %v772_v15  ;;  %v841_v30 = vmul.f32 %v2640_v1, %v798_v14  ;;  %v628_v56 = vpop.permute.xlu1 %627  ;;  %v974_v11 = vadd.f32 %v958_v18, %v926_v39 }
 0x16a   : > { %v959_v20 = vmul.f32 %v2341_v60, %v839_v0  ;;  %v2674_v37 = vadd.f32 %v1214_v54, %v1182_v36  ;;  %v928_v15 = vadd.f32 %v912_v2, %v880_v49  ;;  %v680_v18 = vsel %vm416_vm0, 0.0, %v628_v56 }
 0x16b   : > { %v1088_v21 = vmul.f32 %v2565_v33, %v840_v19  ;;  %v1089_v31 = vmul.f32 %v2565_v33, %v841_v30  ;;  %v630_v58 = vpop.permute.xlu0 %629  ;;  %1262 = vrot.lane.b32.xlu1 %v974_v11, %s2064_s20  ;;  %v960_v53 = vmul.f32 %v2341_v60, %v840_v19  ;;  %v961_v4 = vmul.f32 %v2341_v60, %v841_v30 }
 0x16c   : > { %3427 = vst [vmem:[#allocation43_spill] sm:$0xff] %v2674_v37  ;;  %v975_v39 = vadd.f32 %v959_v20, %v927_v38  ;;  %v1136_v36 = vmul.f32 %v2345_v62, %v723_v42  ;;  %v2688_v33 = vmul.f32 %v2290_v35, %v2494_v61  ;;  %v2692_v2 = vmul.f32 %v2307_v43, %v2494_v61 }
 0x16d   : > { %v632_v10 = vpop.permute.xlu1 %631  ;;  %v654_v49 = vsel %vm416_vm0, %v628_v56, %v630_v58  ;;  %v976_v54 = vadd.f32 %v960_v53, %v928_v15  ;;  %v929_v60 = vadd.f32 %v913_v59, %v881_v63  ;;  %v1215_v42 = vmul.f32 %v2353_v6, %v839_v0 }
 0x16e   : > { %1264 = vrot.lane.b32.xlu0 %v975_v39, %s2064_s20  ;;  %v2698_v14 = vmul.f32 %v2576_v23, %v680_v18  ;;  %v1183_v25 = vadd.f32 %v1167_v48, %v1135_v55  ;;  %v2702_v11 = vmul.f32 %v2290_v35, %v2499_v28  ;;  %v915_v38 = vmul.f32 %v2335_v57, %v2439_v41 }
 0x16f   : > { %v634_v45 = vpop.permute.xlu0 %633  ;;  %v1137_v56 = vmul.f32 %v2345_v62, %v2615_v13  ;;  %v655_v20 = vsel %vm416_vm0, %v630_v58, %v632_v10  ;;  %1266 = vrot.lane.b32.xlu1 %v976_v54, %s2064_s20  ;;  %v977_v0 = vadd.f32 %v961_v4, %v929_v60  ;;  %v1216_v59 = vmul.f32 %v2353_v6, %v840_v19 }
 0x170   : > { %3428 = vst [vmem:[#allocation44_spill] sm:$0xff] %v2698_v14  ;;  %v2712_v63 = vmul.f32 %v2580_v27, %v654_v49  ;;  %v2716_v55 = vmul.f32 %v2307_v43, %v2504_v29  ;;  %v2720_v41 = vmul.f32 %v2290_v35, %v2508_v12  ;;  %v2723_v62 = vadd.f32 %v1086_v22, %v2612_v8 }
 0x171   : > { %v746_v48 = vpop.permute.xlu1 %745  ;;  %v1217_v13 = vmul.f32 %v2353_v6, %v841_v30  ;;  %v1231_v58 = vadd.f32 %v1215_v42, %v1183_v25  ;;  %v1184_v19 = vadd.f32 %v1168_v46, %v1136_v36  ;;  %v917_v15 = vmul.f32 %v2335_v57, %v2445_v9 }
 0x172   : > { %3429 = vst [vmem:[#allocation45_spill] sm:$0xff] %v2723_v62  ;;  %1268 = vrot.lane.b32.xlu0 %v977_v0, %s2064_s20  ;;  %v882_v18 = vmul.f32 %v2574_v24, %v2698_v14  ;;  %v2732_v39 = vmul.f32 %v2585_v5, %v655_v20  ;;  %v656_v53 = vsel %vm416_vm0, %v632_v10, %v634_v45  ;;  %v3436_v20 = vld [vmem:[#allocation24_spill] sm:$0xff] }
 0x173   : > { %v748_v4 = vpop.permute.xlu0 %747  ;;  %v2737_v22 = vmul.f32 %v2309_v44, %v2412_v26  ;;  %v1185_v6 = vadd.f32 %v2600_v32, %v1137_v56  ;;  %1413 = vrot.lane.b32.xlu1 %v1231_v58, %s2065_s21  ;;  %v1232_v57 = vadd.f32 %v1216_v59, %v1184_v19  ;;  %v2743_v9 = vadd.f32 %v1087_v47, %v2623_v50 }
 0x174   : > { %v773_v8 = vsel %vm769_vm2, %v746_v48, %v748_v4  ;;  %v883_v30 = vmul.f32 %v2574_v24, %v2712_v63  ;;  %v2752_v46 = vmul.f32 %v2323_v51, %v2412_v26  ;;  %v2755_v32 = vadd.f32 %v1088_v21, %v2652_v52  ;;  %v3435_v52 = vld [vmem:[#allocation41_spill] sm:$0xff] }
 0x175   : > { %3430 = vst [vmem:[#allocation46_spill] sm:$0xff] %v2743_v9  ;;  %v2748_v36 = vmul.f32 %v2617_v3, %v773_v8  ;;  %v750_v10 = vpop.permute.xlu1 %749  ;;  %v728_v49 = vmul.f32 %v2591_v16, %v656_v53  ;;  %v1233_v47 = vadd.f32 %v1217_v13, %v1185_v6  ;;  %v2761_v54 = vadd.f32 %v1089_v31, %v2656_v34  ;;  %v3445_v9 = vld [vmem:[#allocation30_spill] sm:$0xff] }
 0x176   : > { %3432 = vst [vmem:[#allocation48_spill] sm:$0xff] %v2752_v46  ;;  %3433 = vst [vmem:[#allocation49_spill] sm:$0xff] %v2755_v32  ;;  %1415 = vrot.lane.b32.xlu0 %v1232_v57, %s2065_s21  ;;  %v774_v50 = vsel %vm769_vm2, %v748_v4, %v750_v10  ;;  %v930_v60 = vadd.f32 %v2621_v7, %v882_v18  ;;  %v884_v42 = vmul.f32 %v2574_v24, %v2732_v39  ;;  %v3438_v57 = vld [vmem:[#allocation20_spill] sm:$0xff]  ;;  %v3453_v46 = vld [vmem:[#allocation34_spill] sm:$0xff] }
 0x177   : > { %3431 = vst [vmem:[#allocation47_spill] sm:$0xff] %v2748_v36  ;;  %3434 = vst [vmem:[#allocation50_spill] sm:$0xff] %v2761_v54  ;;  %v962_v26 = vmul.f32 %v2301_v40, %v2748_v36  ;;  %v843_v21 = vmul.f32 %v3435_v52, %v774_v50  ;;  %v752_v45 = vpop.permute.xlu0 %751  ;;  %1417 = vrot.lane.b32.xlu1 %v1233_v47, %s2065_s21  ;;  %v2774_v34 = vmul.f32 %v2309_v44, %v3436_v20  ;;  %v3442_v54 = vld [vmem:[#allocation11_spill] sm:$0xff] }
 0x178   : > { %v775_v25 = vsel %vm769_vm2, %v750_v10, %v752_v45  ;;  %v799_v56 = vsel %vm769_vm2, %v752_v45, 0.0  ;;  %v2778_v7 = vmul.f32 %v2290_v35, %v2504_v29  ;;  %v2784_v13 = vmul.f32 %v2307_v43, %v2499_v28  ;;  %v3437_v35 = vld [vmem:[#allocation42_spill] sm:$0xff]  ;;  %v3440_v45 = vld [vmem:[#allocation21_spill] sm:$0xff] }
 0x179   : > { %v844_v31 = vmul.f32 %v2635_v17, %v775_v25  ;;  %v845_v0 = vmul.f32 %v2640_v1, %v799_v56  ;;  %v636_v59 = vpop.permute.xlu1 %635  ;;  %v978_v48 = vadd.f32 %v962_v26, %v930_v60  ;;  %v885_v58 = vmul.f32 %v2574_v24, %v728_v49  ;;  %v3439_v24 = vld [vmem:[#allocation17_spill] sm:$0xff] }
 0x17a   : > { %v931_v19 = vadd.f32 %v915_v38, %v883_v30  ;;  %v963_v18 = vmul.f32 %v2301_v40, %v843_v21  ;;  %v2790_v53 = vmul.f32 %v2307_v43, %v2508_v12  ;;  %v932_v4 = vadd.f32 %v3437_v35, %v884_v42  ;;  %v3441_v56 = vld [vmem:[#allocation13_spill] sm:$0xff] }
 0x17b   : > { %v964_v6 = vmul.f32 %v2301_v40, %v844_v31  ;;  %v638_v8 = vpop.permute.xlu0 %637  ;;  %v2796_v10 = vmul.f32 %v2309_v44, %v3438_v57  ;;  %v2800_v50 = vmul.f32 %v2323_v51, %v3438_v57  ;;  %v1140_v38 = vmul.f32 %v3439_v24, %v2732_v39  ;;  %1270 = vrot.lane.b32.xlu1 %v978_v48, %s2064_s20 }
 0x17c   : > { %v681_v30 = vsel %vm416_vm0, 0.0, %v636_v59  ;;  %v979_v43 = vadd.f32 %v963_v18, %v931_v19  ;;  %v965_v47 = vmul.f32 %v2301_v40, %v845_v0  ;;  %v1139_v60 = vmul.f32 %v3439_v24, %v2712_v63 }
 0x17d   : > { %v640_v42 = vpop.permute.xlu1 %639  ;;  %v980_v26 = vadd.f32 %v964_v6, %v932_v4  ;;  %v2811_v25 = vmul.f32 %v2309_v44, %v3440_v45  ;;  %v2815_v35 = vmul.f32 %v3441_v56, %v2494_v61  ;;  %v1141_v57 = vmul.f32 %v3439_v24, %v728_v49 }
 0x17e   : > { %v1220_v48 = vmul.f32 %v3442_v54, %v844_v31  ;;  %1272 = vrot.lane.b32.xlu0 %v979_v43, %s2064_s20  ;;  %v933_v40 = vadd.f32 %v917_v15, %v885_v58  ;;  %v2822_v19 = vmul.f32 %v3441_v56, %v2499_v28  ;;  %v729_v18 = vmul.f32 %v2576_v23, %v681_v30  ;;  %v3443_v43 = vld [vmem:[#allocation32_spill] sm:$0xff]  ;;  %v3444_v58 = vld [vmem:[#allocation29_spill] sm:$0xff] }
 0x17f   : > { %v657_v44 = vsel %vm416_vm0, %v636_v59, %v638_v8  ;;  %v642_v4 = vpop.permute.xlu0 %641  ;;  %v2828_v61 = vmul.f32 %v3441_v56, %v2504_v29  ;;  %v2832_v6 = vmul.f32 %v3441_v56, %v2508_v12  ;;  %v1010_v15 = vmul.f32 %v3443_v43, %v2698_v14  ;;  %1274 = vrot.lane.b32.xlu1 %v980_v26, %s2064_s20  ;;  %v3452_v14 = vld [vmem:[#allocation33_spill] sm:$0xff] }
 0x180   : > { %v1188_v32 = vadd.f32 %v3444_v58, %v1140_v38  ;;  %v981_v28 = vadd.f32 %v965_v47, %v933_v40  ;;  %v1219_v30 = vmul.f32 %v3442_v54, %v843_v21  ;;  %v1011_v59 = vmul.f32 %v3443_v43, %v2712_v63  ;;  %v3446_v40 = vld [vmem:[#allocation31_spill] sm:$0xff]  ;;  %v3447_v63 = vld [vmem:[#allocation16_spill] sm:$0xff] }
 0x181   : > { %v2843_v29 = vmul.f32 %v3443_v43, %v2732_v39  ;;  %v2846_v12 = vmul.f32 %v3443_v43, %v728_v49  ;;  %v754_v56 = vpop.permute.xlu1 %753  ;;  %v1187_v62 = vadd.f32 %v3445_v9, %v1139_v60  ;;  %v730_v38 = vmul.f32 %v2580_v27, %v657_v44  ;;  %v3448_v49 = vld [vmem:[#allocation39_spill] sm:$0xff] }
 0x182   : > { %v658_v26 = vsel %vm416_vm0, %v638_v8, %v640_v42  ;;  %1276 = vrot.lane.b32.xlu0 %v981_v28, %s2064_s20  ;;  %v1236_v47 = vadd.f32 %v1220_v48, %v1188_v32  ;;  %v1189_v58 = vadd.f32 %v3446_v40, %v1141_v57  ;;  %v2855_v37 = vmul.f32 %v3447_v63, %v2748_v36 }
 0x183   : > { %v2858_v39 = vmul.f32 %v3447_v63, %v843_v21  ;;  %v886_v43 = vmul.f32 %v3448_v49, %v729_v18  ;;  %v756_v24 = vpop.permute.xlu0 %755  ;;  %v1221_v9 = vmul.f32 %v3442_v54, %v845_v0  ;;  %v2863_v60 = vmul.f32 %v3447_v63, %v844_v31  ;;  %v3449_v21 = vld [vmem:[#allocation18_spill] sm:$0xff]  ;;  %v3450_v31 = vld [vmem:[#allocation9_spill] sm:$0xff] }
 0x184   : > { %v659_v8 = vsel %vm416_vm0, %v640_v42, %v642_v4  ;;  %v776_v32 = vsel %vm769_vm2, %v754_v56, %v756_v24  ;;  %1423 = vrot.lane.b32.xlu1 %v1236_v47, %s2065_s21  ;;  %v1235_v57 = vadd.f32 %v1219_v30, %v1187_v62  ;;  %v2869_v48 = vmul.f32 %v3447_v63, %v845_v0  ;;  %v3451_v56 = vld [vmem:[#allocation7_spill] sm:$0xff] }
 0x185   : > { %v2872_v44 = vmul.f32 %v3449_v21, %v729_v18  ;;  %v731_v28 = vmul.f32 %v2585_v5, %v658_v26  ;;  %v846_v40 = vmul.f32 %v2617_v3, %v776_v32  ;;  %v758_v54 = vpop.permute.xlu1 %757  ;;  %v1142_v36 = vmul.f32 %v3450_v31, %v729_v18 }
 0x186   : > { %v887_v42 = vmul.f32 %v3448_v49, %v730_v38  ;;  %v1143_v4 = vmul.f32 %v3450_v31, %v730_v38  ;;  %1421 = vrot.lane.b32.xlu0 %v1235_v57, %s2065_s21  ;;  %v777_v62 = vsel %vm769_vm2, %v756_v24, %v758_v54  ;;  %v934_v0 = vadd.f32 %v2688_v33, %v886_v43 }
 0x187   : > { %v732_v30 = vmul.f32 %v2591_v16, %v659_v8  ;;  %v966_v47 = vmul.f32 %v3451_v56, %v846_v40  ;;  %v760_v26 = vpop.permute.xlu0 %759  ;;  %v1237_v63 = vadd.f32 %v1221_v9, %v1189_v58  ;;  %v1058_v20 = vadd.f32 %v3452_v14, %v1010_v15  ;;  %v3454_v58 = vld [vmem:[#allocation8_spill] sm:$0xff] }
 0x188   : > { %v778_v32 = vsel %vm769_vm2, %v758_v54, %v760_v26  ;;  %v800_v18 = vsel %vm769_vm2, %v760_v26, 0.0  ;;  %v1059_v51 = vadd.f32 %v3453_v46, %v1011_v59  ;;  %v888_v57 = vmul.f32 %v3448_v49, %v731_v28 }
 0x189   : > { %v1144_v24 = vmul.f32 %v3450_v31, %v731_v28  ;;  %v847_v33 = vmul.f32 %v3435_v52, %v777_v62  ;;  %v848_v43 = vmul.f32 %v2635_v17, %v778_v32  ;;  %v644_v8 = vpop.permute.xlu1 %643  ;;  %v2893_v45 = vmul.f32 %v3449_v21, %v730_v38 }
 0x18a   : > { %v1222_v54 = vmul.f32 %v3454_v58, %v846_v40  ;;  %v849_v9 = vmul.f32 %v2640_v1, %v800_v18  ;;  %1425 = vrot.lane.b32.xlu0 %v1237_v63, %s2065_s21  ;;  %v982_v14 = vadd.f32 %v966_v47, %v934_v0  ;;  %v1190_v46 = vadd.f32 %v2692_v2, %v1142_v36 }
 0x18b   : > { %v889_v15 = vmul.f32 %v3448_v49, %v732_v30  ;;  %v1145_v59 = vmul.f32 %v3450_v31, %v732_v30  ;;  %v682_v62 = vsel %vm416_vm0, 0.0, %v644_v8  ;;  %v646_v26 = vpop.permute.xlu0 %645  ;;  %v935_v32 = vadd.f32 %v2702_v11, %v887_v42 }
 0x18c   : > { %v2904_v38 = vmul.f32 %v3449_v21, %v731_v28  ;;  %1278 = vrot.lane.b32.xlu1 %v982_v14, %s2064_s20  ;;  %v968_v18 = vmul.f32 %v3451_v56, %v848_v43  ;;  %v1191_v0 = vadd.f32 %v2784_v13, %v1143_v4  ;;  %v2910_v2 = vadd.f32 %v2716_v55, %v1144_v24  ;;  %v3455_v55 = vld [vmem:[#allocation26_spill] sm:$0xff] }
 0x18d   : > { %v660_v36 = vsel %vm416_vm0, %v644_v8, %v646_v26  ;;  %v648_v49 = vpop.permute.xlu1 %647  ;;  %v936_v31 = vadd.f32 %v2778_v7, %v888_v57  ;;  %v1223_v47 = vmul.f32 %v3454_v58, %v847_v33  ;;  %v967_v11 = vmul.f32 %v3451_v56, %v847_v33 }
 0x18e   : > { %v969_v28 = vmul.f32 %v3451_v56, %v849_v9  ;;  %v733_v42 = vmul.f32 %v2576_v23, %v682_v62  ;;  %v1238_v63 = vadd.f32 %v1222_v54, %v1190_v46  ;;  %v937_v14 = vadd.f32 %v2720_v41, %v889_v15  ;;  %v3456_v54 = vld [vmem:[#allocation6_spill] sm:$0xff] }
 0x18f   : > { %v2920_v13 = vmul.f32 %v3449_v21, %v732_v30  ;;  %v1094_v4 = vmul.f32 %v3455_v55, %v846_v40  ;;  %v650_v24 = vpop.permute.xlu0 %649  ;;  %v1193_v8 = vadd.f32 %v2790_v53, %v1145_v59  ;;  %v2925_v7 = vmul.f32 %v3455_v55, %v847_v33 }
 0x190   : > { %v2928_v57 = vmul.f32 %v3455_v55, %v848_v43  ;;  %v734_v56 = vmul.f32 %v2580_v27, %v660_v36  ;;  %v984_v23 = vadd.f32 %v968_v18, %v936_v31  ;;  %1427 = vrot.lane.b32.xlu1 %v1238_v63, %s2065_s21  ;;  %v2933_v41 = vmul.f32 %v3455_v55, %v849_v9  ;;  %v3457_v36 = vld [vmem:[#allocation35_spill] sm:$0xff]  ;;  %v3459_v63 = vld [vmem:[#allocation10_spill] sm:$0xff] }
 0x191   : > { %v1224_v21 = vmul.f32 %v3454_v58, %v848_v43  ;;  %v662_v40 = vsel %vm416_vm0, %v648_v49, %v650_v24  ;;  %v762_v30 = vpop.permute.xlu1 %761  ;;  %v1239_v53 = vadd.f32 %v1223_v47, %v1191_v0  ;;  %v890_v33 = vmul.f32 %v3456_v54, %v733_v42  ;;  %v3458_v31 = vld [vmem:[#allocation19_spill] sm:$0xff] }
 0x192   : > { %1282 = vrot.lane.b32.xlu0 %v984_v23, %s2064_s20  ;;  %v983_v46 = vadd.f32 %v967_v11, %v935_v32  ;;  %v1225_v15 = vmul.f32 %v3454_v58, %v849_v9  ;;  %v985_v27 = vadd.f32 %v969_v28, %v937_v14  ;;  %v661_v59 = vsel %vm416_vm0, %v646_v26, %v648_v49 }
 0x193   : > { %v764_v62 = vpop.permute.xlu0 %763  ;;  %v2942_v18 = vadd.f32 %v2855_v37, %v1058_v20  ;;  %v2945_v43 = vadd.f32 %v2858_v39, %v1059_v51  ;;  %v1060_v0 = vadd.f32 %v3457_v36, %v2843_v29  ;;  %v1018_v47 = vmul.f32 %v3458_v31, %v733_v42  ;;  %v3460_v39 = vld [vmem:[#allocation36_spill] sm:$0xff] }
 0x194   : > { %v1146_v55 = vmul.f32 %v3459_v63, %v733_v42  ;;  %v891_v32 = vmul.f32 %v3456_v54, %v734_v56  ;;  %v2953_v58 = vmul.f32 %v2591_v16, %v662_v40  ;;  %1280 = vrot.lane.b32.xlu1 %v983_v46, %s2064_s20  ;;  %v779_v37 = vsel %vm769_vm2, %v762_v30, %v764_v62 }
 0x195   : > { %v766_v20 = vpop.permute.xlu1 %765  ;;  %v2958_v51 = vadd.f32 %v2863_v60, %v1060_v0  ;;  %v1061_v29 = vadd.f32 %v3460_v39, %v2846_v12  ;;  %v1062_v9 = vadd.f32 %v2815_v35, %v2872_v44  ;;  %v735_v26 = vmul.f32 %v2585_v5, %v661_v59  ;;  %v3461_v44 = vld [vmem:[#allocation5_spill] sm:$0xff] }
 0x196   : > { %v850_v49 = vmul.f32 %v2617_v3, %v779_v37  ;;  %1429 = vrot.lane.b32.xlu0 %v1239_v53, %s2065_s21  ;;  %v780_v16 = vsel %vm769_vm2, %v764_v62, %v766_v20  ;;  %v1241_v11 = vadd.f32 %v1225_v15, %v1193_v8  ;;  %v938_v60 = vadd.f32 %v2796_v10, %v890_v33  ;;  %v3462_v15 = vld [vmem:[#allocation14_spill] sm:$0xff]  ;;  %v3465_v37 = vld [vmem:[#allocation25_spill] sm:$0xff] }
 0x197   : > { %v851_v28 = vmul.f32 %v3435_v52, %v780_v16  ;;  %v768_v42 = vpop.permute.xlu0 %767  ;;  %v2971_v14 = vadd.f32 %v2869_v48, %v1061_v29  ;;  %v2973_v12 = vadd.f32 %v1094_v4, %v1062_v9  ;;  %v893_v5 = vmul.f32 %v3456_v54, %v2953_v58 }
 0x198   : > { %v781_v3 = vsel %vm769_vm2, %v766_v20, %v768_v42  ;;  %v801_v35 = vsel %vm769_vm2, %v768_v42, 0.0  ;;  %1284 = vrot.lane.b32.xlu1 %v985_v27, %s2064_s20  ;;  %v970_v24 = vmul.f32 %v3461_v44, %v850_v49  ;;  %v1019_v52 = vmul.f32 %v3458_v31, %v734_v56  ;;  %v3463_v27 = vld [vmem:[#allocation15_spill] sm:$0xff]  ;;  %v3469_v42 = vld [vmem:[#allocation12_spill] sm:$0xff] }
 0x199   : > { %v1147_v10 = vmul.f32 %v3459_v63, %v734_v56  ;;  %v971_v48 = vmul.f32 %v3461_v44, %v851_v28  ;;  %v852_v4 = vmul.f32 %v2635_v17, %v781_v3  ;;  %v939_v8 = vadd.f32 %v2737_v22, %v891_v32 }
 0x19a   : > { %v853_v23 = vmul.f32 %v2640_v1, %v801_v35  ;;  %1433 = vrot.lane.b32.xlu0 %v1241_v11, %s2065_s21  ;;  %v986_v40 = vadd.f32 %v970_v24, %v938_v60  ;;  %v1240_v30 = vadd.f32 %v1224_v21, %v2910_v2  ;;  %v892_v53 = vmul.f32 %v3456_v54, %v735_v26 }
 0x19b   : > { %v1020_v33 = vmul.f32 %v3458_v31, %v735_v26  ;;  %v1021_v56 = vmul.f32 %v3458_v31, %v2953_v58  ;;  %v1194_v46 = vadd.f32 %v2800_v50, %v1146_v55  ;;  %v941_v17 = vadd.f32 %v2774_v34, %v893_v5  ;;  %v3464_v55 = vld [vmem:[#allocation22_spill] sm:$0xff]  ;;  %v3470_v5 = vld [vmem:[#allocation48_spill] sm:$0xff] }
 0x19c   : > { %v1098_v22 = vmul.f32 %v3462_v15, %v850_v49  ;;  %v1099_v1 = vmul.f32 %v3462_v15, %v851_v28  ;;  %1431 = vrot.lane.b32.xlu1 %v1240_v30, %s2065_s21  ;;  %v1226_v59 = vmul.f32 %v3463_v27, %v850_v49  ;;  %v1100_v2 = vmul.f32 %v3462_v15, %v852_v4  ;;  %v3474_v30 = vld [vmem:[#allocation47_spill] sm:$0xff] }
 0x19d   : > { %v987_v21 = vadd.f32 %v971_v48, %v939_v8  ;;  %v972_v54 = vmul.f32 %v3461_v44, %v852_v4  ;;  %v1063_v62 = vadd.f32 %v2822_v19, %v2893_v45  ;;  %v973_v50 = vmul.f32 %v3461_v44, %v853_v23  ;;  %v3466_v45 = vld [vmem:[#allocation23_spill] sm:$0xff] }
 0x19e   : > { %v1101_v34 = vmul.f32 %v3462_v15, %v853_v23  ;;  %1286 = vrot.lane.b32.xlu0 %v986_v40, %s2064_s20  ;;  %v1064_v36 = vadd.f32 %v2828_v61, %v2904_v38  ;;  %v1065_v0 = vadd.f32 %v2832_v6, %v2920_v13  ;;  %v1066_v32 = vadd.f32 %v3464_v55, %v1018_v47  ;;  %v3467_v38 = vld [vmem:[#allocation27_spill] sm:$0xff] }
 0x19f   : > { %v3011_v31 = vadd.f32 %v2925_v7, %v1063_v62  ;;  %v1067_v20 = vadd.f32 %v3465_v37, %v1019_v52  ;;  %v1068_v19 = vadd.f32 %v3466_v45, %v1020_v33  ;;  %v1242_v39 = vadd.f32 %v1226_v59, %v1194_v46  ;;  %v3473_v52 = vld [vmem:[#allocation17_spill] sm:$0xff]  ;;  %v3476_v33 = vld [vmem:[#allocation28_spill] sm:$0xff]  ;;  %v3477_v15 = vld [vmem:[#allocation43_spill] sm:$0xff] }
 0x1a0   : > { %1288 = vrot.lane.b32.xlu1 %v987_v21, %s2064_s20  ;;  %v3018_v29 = vadd.f32 %v2928_v57, %v1064_v36  ;;  %v3021_v61 = vadd.f32 %v2933_v41, %v1065_v0  ;;  %v1069_v6 = vadd.f32 %v3467_v38, %v1021_v56  ;;  %v1148_v13 = vmul.f32 %v3459_v63, %v735_v26  ;;  %v3468_v41 = vld [vmem:[#allocation21_spill] sm:$0xff]  ;;  %v3479_v0 = vld [vmem:[#allocation38_spill] sm:$0xff]  ;;  %v3480_v45 = vld [vmem:[#allocation40_spill] sm:$0xff] }
 0x1a1   : > { %v3025_v7 = vadd.f32 %v1098_v22, %v1066_v32  ;;  %v3027_v47 = vadd.f32 %v1099_v1, %v1067_v20  ;;  %v3029_v9 = vadd.f32 %v1100_v2, %v1068_v19  ;;  %v1227_v49 = vmul.f32 %v3463_v27, %v851_v28  ;;  %v3471_v28 = vld [vmem:[#allocation24_spill] sm:$0xff]  ;;  %v1600_v22 = vld [vmem:[%s3344_s6] sm:$0xff]  ;;  %v1667_v1 = vld [vmem:[%s3347_s9 + $0x8] sm:$0xff] }
 0x1a2   : > { %1435 = vrot.lane.b32.xlu0 %v1242_v39, %s2065_s21  ;;  %v940_v57 = vadd.f32 %v2811_v25, %v892_v53  ;;  %v989_v16 = vadd.f32 %v973_v50, %v941_v17  ;;  %v3034_v11 = vadd.f32 %v1101_v34, %v1069_v6  ;;  %v1180_v60 = vmul.f32 %v3469_v42, %v3468_v41  ;;  %v3472_v25 = vld [vmem:[#allocation44_spill] sm:$0xff]  ;;  %v3475_v53 = vld [vmem:[#allocation11_spill] sm:$0xff]  ;;  %v3070_v59 = vpop.permute.xlu1 %1565 }
 0x1a3   : > { %v1195_v26 = vadd.f32 %v3470_v5, %v1147_v10  ;;  %v1149_v3 = vmul.f32 %v3459_v63, %v2953_v58  ;;  %v1228_v35 = vmul.f32 %v3463_v27, %v852_v4  ;;  %v1181_v24 = vmul.f32 %v3469_v42, %v3471_v28  ;;  %v3483_v28 = vld [vmem:[#allocation49_spill] sm:$0xff] }
 0x1a4   : > { %v988_v44 = vadd.f32 %v972_v54, %v940_v57  ;;  %1292 = vrot.lane.b32.xlu1 %v989_v16, %s2064_s20  ;;  %v1138_v48 = vmul.f32 %v3473_v52, %v3472_v25  ;;  %v1196_v8 = vadd.f32 %v1180_v60, %v1148_v13  ;;  %v1229_v40 = vmul.f32 %v3463_v27, %v853_v23  ;;  %v1601_v23 = vld [vmem:[%s3344_s6 + $0x8] sm:$0xff]  ;;  %v1666_v27 = vld [vmem:[%s3347_s9] sm:$0xff]  ;;  %v3072_v2 = vpop.permute.xlu0 %1560 }
 0x1a5   : > { %v1243_v10 = vadd.f32 %v1227_v49, %v1195_v26  ;;  %v1218_v63 = vmul.f32 %v3475_v53, %v3474_v30  ;;  %v1197_v58 = vadd.f32 %v1181_v24, %v1149_v3  ;;  %v3478_v54 = vld [vmem:[#allocation37_spill] sm:$0xff]  ;;  %vm1294_vm0 = vcmask 7168   ;;  %v3482_v3 = vld [vmem:[#allocation46_spill] sm:$0xff] }
 0x1a6   : > { %1290 = vrot.lane.b32.xlu0 %v988_v44, %s2064_s20  ;;  %v1244_v4 = vadd.f32 %v1228_v35, %v1196_v8  ;;  %v1186_v56 = vadd.f32 %v3476_v33, %v1138_v48  ;;  %v3074_v21 = vpop.permute.xlu1 %1616  ;;  %v1329_v62 = vsub.s32 2, %v3478_v54  ;;  %v1333_v34 = vsub.s32 6, %v3478_v54  ;;  %v3481_v16 = vld [vmem:[#allocation45_spill] sm:$0xff]  ;;  %s1991_s20 = scalar_lea.vmem %s3293_s29, 1024 }
 0x1a7   : > { %v1245_v46 = vadd.f32 %v1229_v40, %v1197_v58  ;;  %v1478_v33 = vsub.s32 3, %v3478_v54  ;;  %p1992_p11 = scmp.ne.s32.totalorder %s3293_s29, %s1991_s20 }
 0x1a8   : > { %1437 = vrot.lane.b32.xlu1 %v1243_v10, %s2065_s21  ;;  %v1234_v17 = vadd.f32 %v1218_v63, %v1186_v56  ;;  %v3077_v50 = vpop.permute.xlu0 %1621  ;;  %v1330_v55 = vrot.slane %v3479_v0, %v1329_v62  ;;  %v1334_v32 = vrot.slane %v3479_v0, %v1333_v34  ;;  %v1338_v19 = vrot.slane %v3480_v45, %v1329_v62 }
 0x1a9   : > { %p1993_p12 = pnand %p1992_p11, %p2161_p5 }
 0x1aa   : > { %1439 = vrot.lane.b32.xlu0 %v1244_v4, %s2065_s21  ;;  %v3080_v36 = vpop.permute.xlu1 %1550  ;;  %v3084_v37 = vrot.slane %v1330_v55, %v1329_v62  ;;  %v3090_v6 = vrot.slane %v1334_v32, %v1329_v62  ;;  %v3093_v57 = vrot.slane %v1338_v19, %v1329_v62  ;;  %v1482_v4 = vsub.s32 7, %v3478_v54 }
 0x1ab   : > { %v1479_v54 = vrot.slane %v3479_v0, %v1478_v33  ;;  %p1994_p13 = pneg %p1993_p12 }
 0x1ac   : > { %1441 = vrot.lane.b32.xlu1 %v1245_v46, %s2065_s21  ;;  %v3086_v20 = vpop.permute.xlu0 %1555  ;;  %v1483_v46 = vrot.slane %v3479_v0, %v1482_v4  ;;  %v1491_v55 = vrot.slane %v3480_v45, %v1482_v4 }
 0x1ae   : > { %1419 = vrot.lane.b32.xlu0 %v1234_v17, %s2065_s21 }
 0x1b0   : > { %1411 = vrot.lane.b32.xlu1 %v3477_v15, %s2065_s21  ;;  %v1342_v15 = vrot.slane %v3480_v45, %v1333_v34  ;;  %s2066_s21 = smov [#allocation2]  }
 0x1b1   : > { %s1995_s30 = sshll.u32 %s2066_s21, 4  ;;  %s1996_s30 = int_to_ptr.vmem [resolvable:$false] %s1995_s30 }
 0x1b2   : > { %1611 = vperm.xlu0 %1978, %v1601_v23   ;;  %v1487_v23 = vrot.slane %v3480_v45, %v1478_v33  ;;  %p1998_p0 = scmp.lt.s32.totalorder %s3293_s29, %s1996_s30 }
 0x1b4   : > { %1606 = vperm.xlu1 %1979, %v1600_v22   ;;  %v3125_v19 = vrot.slane %v1487_v23, %v1478_v33 }
 0x1b6   : > { %1675 = vperm.xlu0 %1978, %v1667_v1   ;;  %v3119_v1 = vrot.slane %v1483_v46, %v1478_v33 }
 0x1b8   : > { %1670 = vperm.xlu1 %1979, %v1666_v27  }
 0x1dd   : > { %v1263_v39 = vpop.permute.xlu1 %1262 }
 0x1de   : > { %v1323_v38 = vsel %vm1294_vm0, 0.0, %v1263_v39 }
 0x1df   : > { %v1363_v13 = vmul.f32 %v3084_v37, %v1323_v38 }
 0x1e0   : > { %v1265_v49 = vpop.permute.xlu0 %1264 }
 0x1e1   : > { %v3096_v41 = vadd.f32 %v1363_v13, %v3481_v16  ;;  %v1295_v42 = vsel %vm1294_vm0, %v1263_v39, %v1265_v49  ;;  %v1267_v5 = vpop.permute.xlu1 %1266  ;;  %v3127_v39 = vrot.slane %v1342_v15, %v1329_v62  ;;  %v3484_v15 = vld [vmem:[#allocation50_spill] sm:$0xff] }
 0x1e2   : > { %v1364_v60 = vmul.f32 %v3090_v6, %v1295_v42  ;;  %v1296_v26 = vsel %vm1294_vm0, %v1265_v49, %v1267_v5  ;;  %v3133_v42 = vrot.slane %v1491_v55, %v1478_v33 }
 0x1e3   : > { %v1365_v44 = vmul.f32 %v3093_v57, %v1296_v26 }
 0x1e4   : > { %v1380_v35 = vadd.f32 %v1364_v60, %v3482_v3  ;;  %v1269_v25 = vpop.permute.xlu0 %1268  ;;  %v3135_v60 = vrot.slane %v1479_v54, %v1478_v33 }
 0x1e5   : > { %v1381_v24 = vadd.f32 %v1365_v44, %v3483_v28  ;;  %v3104_v52 = vpop.permute.xlu1 %1413  ;;  %v1297_v34 = vsel %vm1294_vm0, %v1267_v5, %v1269_v25 }
 0x1e6   : > { %v1366_v3 = vmul.f32 %v3127_v39, %v1297_v34 }
 0x1e8   : > { %v1416_v8 = vpop.permute.xlu0 %1415 }
 0x1e9   : > { %v1418_v48 = vpop.permute.xlu1 %1417  ;;  %v1445_v27 = vsel %vm1443_vm3, %v3104_v52, %v1416_v8 }
 0x1ea   : > { %v1446_v38 = vsel %vm1443_vm3, %v1416_v8, %v1418_v48  ;;  %v1513_v49 = vmul.f32 %v3119_v1, %v1445_v27  ;;  %v1472_v0 = vsel %vm1443_vm3, %v1418_v48, 0.0 }
 0x1eb   : > { %v1514_v26 = vmul.f32 %v3125_v19, %v1446_v38  ;;  %v1515_v4 = vmul.f32 %v3133_v42, %v1472_v0 }
 0x1ec   : > { %v1529_v25 = vadd.f32 %v1513_v49, %v1380_v35 }
 0x1ed   : > { %v1271_v40 = vpop.permute.xlu1 %1270  ;;  %v1530_v48 = vadd.f32 %v1514_v26, %v1381_v24 }
 0x1ee   : > { %v1324_v44 = vsel %vm1294_vm0, 0.0, %v1271_v40  ;;  %v3151_v38 = vadd.f32 %v3080_v36, %v1529_v25 }
 0x1ef   : > { %v1367_v23 = vmul.f32 %v3084_v37, %v1324_v44  ;;  %v3159_v26 = vadd.f32 %v3080_v36, %v1530_v48 }
 0x1f0   : > { %v1273_v10 = vpop.permute.xlu0 %1272  ;;  %vm1585_vm12 = vcmp.gt.f32.partialorder %v3151_v38, 0.0 }
 0x1f1   : > { %v3106_v30 = vpop.permute.xlu1 %1274  ;;  %v1298_v35 = vsel %vm1294_vm0, %v1271_v40, %v1273_v10  ;;  %vm1586_vm15 = vcmp.gt.f32.partialorder %v3159_v26, 0.0 }
 0x1f2   : > { %v1368_v40 = vmul.f32 %v3090_v6, %v1298_v35 }
 0x1f4   : > { %v1277_v53 = vpop.permute.xlu0 %1276  ;;  %v1384_v48 = vadd.f32 %v1368_v40, %v2945_v43 }
 0x1f6   : > { %v3108_v63 = vpop.permute.xlu1 %1423 }
 0x1f8   : > { %v3110_v58 = vpop.permute.xlu0 %1421 }
 0x1fc   : > { %v3115_v17 = vpop.permute.xlu0 %1425 }
 0x1fe   : > { %v1279_v56 = vpop.permute.xlu1 %1278 }
 0x1ff   : > { %v1325_v16 = vsel %vm1294_vm0, 0.0, %v1279_v56 }
 0x200   : > { %v1371_v5 = vmul.f32 %v3084_v37, %v1325_v16 }
 0x202   : > { %v1428_v22 = vpop.permute.xlu1 %1427  ;;  %v1387_v27 = vadd.f32 %v1371_v5, %v2973_v12  ;;  %v3162_v12 = vadd.f32 %v1367_v23, %v2942_v18  ;;  %v1300_v5 = vsel %vm1294_vm0, %v3106_v30, %v1277_v53  ;;  %v1448_v18 = vsel %vm1443_vm3, %v3110_v58, %v3108_v63 }
 0x203   : > { %v1370_v23 = vmul.f32 %v3127_v39, %v1300_v5 }
 0x204   : > { %v1283_v32 = vpop.permute.xlu0 %1282 }
 0x206   : > { %v1281_v13 = vpop.permute.xlu1 %1280 }
 0x207   : > { %v1301_v16 = vsel %vm1294_vm0, %v1279_v56, %v1281_v13  ;;  %v1302_v24 = vsel %vm1294_vm0, %v1281_v13, %v1283_v32 }
 0x208   : > { %v1430_v45 = vpop.permute.xlu0 %1429 }
 0x209   : > { %v1450_v62 = vsel %vm1443_vm3, %v1428_v22, %v1430_v45  ;;  %v1382_v22 = vadd.f32 %v1366_v3, %v3484_v15 }
 0x20a   : > { %v1285_v28 = vpop.permute.xlu1 %1284  ;;  %v1520_v33 = vmul.f32 %v3135_v60, %v1450_v62  ;;  %v1299_v62 = vsel %vm1294_vm0, %v1273_v10, %v3106_v30  ;;  %v1372_v10 = vmul.f32 %v3090_v6, %v1301_v16  ;;  %v1473_v30 = vsel %vm1443_vm3, %v3115_v17, 0.0 }
 0x20b   : > { %v1303_v8 = vsel %vm1294_vm0, %v1283_v32, %v1285_v28  ;;  %v3154_v34 = vadd.f32 %v1515_v4, %v1382_v22  ;;  %v1373_v28 = vmul.f32 %v3093_v57, %v1302_v24  ;;  %v1369_v25 = vmul.f32 %v3093_v57, %v1299_v62 }
 0x20c   : > { %v1434_v46 = vpop.permute.xlu0 %1433  ;;  %v1374_v55 = vmul.f32 %v3127_v39, %v1303_v8  ;;  %v1536_v49 = vadd.f32 %v1520_v33, %v1387_v27 }
 0x20d   : > { %v1474_v3 = vsel %vm1443_vm3, %v1434_v46, 0.0  ;;  %v1385_v35 = vadd.f32 %v1369_v25, %v2958_v51 }
 0x20e   : > { %v1432_v54 = vpop.permute.xlu1 %1431  ;;  %v1390_v44 = vadd.f32 %v1374_v55, %v3021_v61  ;;  %v1449_v61 = vsel %vm1443_vm3, %v3108_v63, %v3115_v17  ;;  %v1523_v8 = vmul.f32 %v3133_v42, %v1474_v3  ;;  %v1517_v63 = vmul.f32 %v3119_v1, %v1448_v18 }
 0x20f   : > { %v1451_v56 = vsel %vm1443_vm3, %v1430_v45, %v1432_v54  ;;  %v1452_v32 = vsel %vm1443_vm3, %v1432_v54, %v1434_v46  ;;  %v1576_v45 = vadd.f32 %v3072_v2, %v1536_v49  ;;  %v1518_v27 = vmul.f32 %v3125_v19, %v1449_v61 }
 0x210   : > { %v1287_v0 = vpop.permute.xlu0 %1286  ;;  %v1521_v33 = vmul.f32 %v3119_v1, %v1451_v56  ;;  %v1522_v46 = vmul.f32 %v3125_v19, %v1452_v32  ;;  %v1539_v15 = vadd.f32 %v1523_v8, %v1390_v44  ;;  %v1388_v55 = vadd.f32 %v1372_v10, %v3011_v31 }
 0x211   : > { %v1326_v53 = vsel %vm1294_vm0, 0.0, %v1287_v0  ;;  %v1389_v17 = vadd.f32 %v1373_v28, %v3018_v29  ;;  %v1519_v49 = vmul.f32 %v3133_v42, %v1473_v30  ;;  %v1632_v43 = vmul.f32 %v3074_v21, %v1576_v45 }
 0x212   : > { %v1289_v13 = vpop.permute.xlu1 %1288  ;;  %v1375_v16 = vmul.f32 %v3084_v37, %v1326_v53  ;;  %v1537_v62 = vadd.f32 %v1521_v33, %v1388_v55  ;;  %vm1592_vm4 = vcmp.gt.f32.partialorder %v1576_v45, 0.0  ;;  %v1386_v31 = vadd.f32 %v1370_v23, %v2971_v14 }
 0x213   : > { %v1304_v54 = vsel %vm1294_vm0, %v1287_v0, %v1289_v13  ;;  %v1538_v3 = vadd.f32 %v1522_v46, %v1389_v17  ;;  %v3203_v29 = vadd.f32 %v3072_v2, %v1539_v15  ;;  %v1533_v56 = vadd.f32 %v1517_v63, %v1384_v48 }
 0x214   : > { %v1436_v4 = vpop.permute.xlu0 %1435  ;;  %v1376_v0 = vmul.f32 %v3090_v6, %v1304_v54  ;;  %v3207_v32 = vadd.f32 %v1518_v27, %v1385_v35  ;;  %v3211_v18 = vadd.f32 %v1519_v49, %v1386_v31  ;;  %v1648_v28 = vsel %vm1592_vm4, %v1576_v45, %v1632_v43 }
 0x215   : > { %v1577_v6 = vadd.f32 %v3072_v2, %v1537_v62  ;;  %v1578_v25 = vadd.f32 %v3072_v2, %v1538_v3  ;;  %vm1595_vm5 = vcmp.gt.f32.partialorder %v3203_v29, 0.0  ;;  %v1635_v2 = vmul.f32 %v3074_v21, %v3203_v29 }
 0x216   : > { %v1293_v22 = vpop.permute.xlu1 %1292  ;;  %vm1683_vm4 = vcmask 261120  }
 0x217   : > { %vm1593_vm6 = vcmp.gt.f32.partialorder %v1577_v6, 0.0  ;;  %v1633_v63 = vmul.f32 %v3074_v21, %v1577_v6  ;;  %vm1594_vm9 = vcmp.gt.f32.partialorder %v1578_v25, 0.0 }
 0x218   : > { %v1291_v24 = vpop.permute.xlu0 %1290 }
 0x219   : > { %v1305_v40 = vsel %vm1294_vm0, %v1289_v13, %v1291_v24  ;;  %v1306_v51 = vsel %vm1294_vm0, %v1291_v24, %v1293_v22  ;;  %v1391_v13 = vadd.f32 %v1375_v16, %v3025_v7  ;;  %v1649_v43 = vsel %vm1593_vm6, %v1577_v6, %v1633_v63 }
 0x21a   : > { %v1438_v44 = vpop.permute.xlu1 %1437  ;;  %v1377_v37 = vmul.f32 %v3093_v57, %v1305_v40  ;;  %v1378_v61 = vmul.f32 %v3127_v39, %v1306_v51  ;;  %v1392_v57 = vadd.f32 %v1376_v0, %v3027_v47  ;;  %v1573_v51 = vadd.f32 %v3086_v20, %v1533_v56 }
 0x21b   : > { %v1453_v5 = vsel %vm1443_vm3, %v1436_v4, %v1438_v44 }
 0x21c   : > { %v1440_v14 = vpop.permute.xlu0 %1439  ;;  %v1524_v10 = vmul.f32 %v3135_v60, %v1453_v5  ;;  %v1393_v7 = vadd.f32 %v1377_v37, %v3029_v9  ;;  %v1394_v23 = vadd.f32 %v1378_v61, %v3034_v11  ;;  %v1575_v5 = vadd.f32 %v3086_v20, %v3211_v18 }
 0x21d   : > { %v1454_v8 = vsel %vm1443_vm3, %v1438_v44, %v1440_v14  ;;  %vm1589_vm13 = vcmp.gt.f32.partialorder %v1573_v51, 0.0 }
 0x21e   : > { %v1525_v4 = vmul.f32 %v3119_v1, %v1454_v8  ;;  %v1540_v30 = vadd.f32 %v1524_v10, %v1391_v13  ;;  %v1442_v53 = vpop.permute.xlu1 %1441  ;;  %vm1591_vm1 = vcmp.gt.f32.partialorder %v1575_v5, 0.0 }
 0x21f   : > { %v1455_v45 = vsel %vm1443_vm3, %v1440_v14, %v1442_v53  ;;  %v1475_v33 = vsel %vm1443_vm3, %v1442_v53, 0.0 }
 0x220   : > { %v1541_v39 = vadd.f32 %v1525_v4, %v1392_v57  ;;  %v1580_v46 = vadd.f32 %v3070_v59, %v1540_v30  ;;  %v1420_v48 = vpop.permute.xlu0 %1419  ;;  %v1526_v47 = vmul.f32 %v3125_v19, %v1455_v45  ;;  %v1527_v1 = vmul.f32 %v3133_v42, %v1475_v33 }
 0x221   : > { %v1447_v9 = vsel %vm1443_vm3, %v1420_v48, %v3110_v58  ;;  %v1634_v19 = vmul.f32 %v3074_v21, %v1578_v25 }
 0x222   : > { %v1581_v15 = vadd.f32 %v3070_v59, %v1541_v39  ;;  %v1636_v22 = vmul.f32 %v3077_v50, %v1580_v46  ;;  %v1516_v27 = vmul.f32 %v3135_v60, %v1447_v9  ;;  %v1542_v55 = vadd.f32 %v1526_v47, %v1393_v7  ;;  %v1412_v17 = vpop.permute.xlu1 %1411 }
 0x223   : > { %v1543_v54 = vadd.f32 %v1527_v1, %v1394_v23  ;;  %v1444_v11 = vsel %vm1443_vm3, %v1412_v17, %v3104_v52  ;;  %vm1596_vm7 = vcmp.gt.f32.partialorder %v1580_v46, 0.0  ;;  %v1650_v31 = vsel %vm1594_vm9, %v1578_v25, %v1634_v19 }
 0x224   : > { %v1582_v58 = vadd.f32 %v3070_v59, %v1542_v55  ;;  %v1512_v42 = vmul.f32 %v3135_v60, %v1444_v11  ;;  %vm1597_vm8 = vcmp.gt.f32.partialorder %v1581_v15, 0.0  ;;  %v1637_v49 = vmul.f32 %v3077_v50, %v1581_v15 }
 0x225   : > { %v1583_v35 = vadd.f32 %v3070_v59, %v1543_v54  ;;  %v1652_v16 = vsel %vm1596_vm7, %v1580_v46, %v1636_v22  ;;  %v1532_v21 = vadd.f32 %v1516_v27, %v3162_v12  ;;  %v1571_v59 = vadd.f32 %v3080_v36, %v3154_v34  ;;  %v1982_v46 = vld [vmem:[%s3346_s8] sm:$0xff]  }
 0x226   : > { %v1638_v24 = vmul.f32 %v3077_v50, %v1582_v58  ;;  %v1528_v52 = vadd.f32 %v1512_v42, %v3096_v41  ;;  %v1662_v62 = vpack.c.bf16 %v1652_v16, %v1648_v28  ;;  %v1653_v3 = vsel %vm1597_vm8, %v1581_v15, %v1637_v49  ;;  %v1983_v15 = vld [vmem:[%s2201_s28] sm:$0xff] }
 0x227   : > { %vm1599_vm10 = vcmp.gt.f32.partialorder %v1583_v35, 0.0  ;;  %v1639_v60 = vmul.f32 %v3077_v50, %v1583_v35  ;;  %vm1598_vm11 = vcmp.gt.f32.partialorder %v1582_v58, 0.0  ;;  %v1663_v40 = vpack.c.bf16 %v1653_v3, %v1649_v43  ;;  %v1984_v27 = vld [vmem:[%s2201_s28 + $0x20] sm:$0xff]  ;;  %v1988_v3 = vld [vmem:[%s2201_s28 + $0x30] sm:$0xff] }
 0x228   : > { %v1654_v0 = vsel %vm1598_vm11, %v1582_v58, %v1638_v24  ;;  %v1651_v12 = vsel %vm1595_vm5, %v3203_v29, %v1635_v2  ;;  %v1574_v50 = vadd.f32 %v3086_v20, %v3207_v32  ;;  %v1572_v34 = vadd.f32 %v3086_v20, %v1532_v21  ;;  %v1985_v58 = vld [vmem:[%s2201_s28 + $0x8] sm:$0xff] }
 0x229   : > { %v1655_v44 = vsel %vm1599_vm10, %v1583_v35, %v1639_v60  ;;  %v1664_v41 = vpack.c.bf16 %v1654_v0, %v1650_v31  ;;  %1699 = vmatprep.subr.bf16.mxu0 %v1663_v40  ;;  %v1568_v13 = vadd.f32 %v3080_v36, %v1528_v52  ;;  %vm1587_vm14 = vcmp.gt.f32.partialorder %v1571_v59, 0.0  ;;  %v1986_v35 = vld [vmem:[%s2201_s28 + $0x28] sm:$0xff]  ;;  %v1987_v52 = vld [vmem:[%s2201_s28 + $0x10] sm:$0xff]  ;;  %v1989_v31 = vld [vmem:[%s2201_s28 + $0x18] sm:$0xff] }
 0x22a   : > { %v1665_v37 = vpack.c.bf16 %v1655_v44, %v1651_v12  ;;  %1700 = vmatpush1.bf16.msra.mxu0 %v1662_v62  ;;  %vm1588_vm0 = vcmp.gt.f32.partialorder %v1572_v34, 0.0  ;;  %vm1590_vm3 = vcmp.gt.f32.partialorder %v1574_v50, 0.0 }
 0x22b   : > { %vm1584_vm2 = vcmp.gt.f32.partialorder %v1568_v13, 0.0 }
 0x22c   : > { %1742 = vmatprep.subr.bf16.mxu1 %v1665_v37 }
 0x22d   : > { %v1612_v56 = vpop.permute.xlu0 %1611  ;;  %1743 = vmatpush1.bf16.msra.mxu1 %v1664_v41 }
 0x22e   : > { %v1628_v29 = vmul.f32 %v1612_v56, %v1572_v34  ;;  %v1629_v14 = vmul.f32 %v1612_v56, %v1573_v51  ;;  %v1630_v32 = vmul.f32 %v1612_v56, %v1574_v50  ;;  %v1631_v10 = vmul.f32 %v1612_v56, %v1575_v5 }
 0x22f   : > { %v1607_v28 = vpop.permute.xlu1 %1606 }
 0x230   : > { %v1624_v36 = vmul.f32 %v1607_v28, %v1568_v13  ;;  %v1625_v20 = vmul.f32 %v1607_v28, %v3151_v38  ;;  %v1626_v18 = vmul.f32 %v1607_v28, %v3159_v26  ;;  %v1627_v6 = vmul.f32 %v1607_v28, %v1571_v59 }
 0x231   : > { %v1645_v25 = vsel %vm1589_vm13, %v1573_v51, %v1629_v14  ;;  %v1647_v61 = vsel %vm1591_vm1, %v1575_v5, %v1631_v10  ;;  %v1644_v8 = vsel %vm1588_vm0, %v1572_v34, %v1628_v29  ;;  %v1646_v57 = vsel %vm1590_vm3, %v1574_v50, %v1630_v32  ;;  %v1676_v63 = vpop.permute.xlu0 %1675  ;;  %v1990_v51 = vld [vmem:[%s2201_s28 + $0x38] sm:$0xff]  ;;  %s1997_s28 = scalar_lea.vmem %s1996_s30, 2048 }
 0x232   : > { %v1641_v4 = vsel %vm1585_vm12, %v3151_v38, %v1625_v20  ;;  %v1643_v30 = vsel %vm1587_vm14, %v1571_v59, %v1627_v6  ;;  %v1640_v53 = vsel %vm1584_vm2, %v1568_v13, %v1624_v36  ;;  %v1642_v7 = vsel %vm1586_vm15, %v3159_v26, %v1626_v18  ;;  %p1999_p1 = scmp.lt.s32.totalorder %s1997_s28, %s1991_s20 }
 0x233   : > { %v1659_v45 = vpack.c.bf16 %v1645_v25, %v1641_v4  ;;  %v1661_v33 = vpack.c.bf16 %v1647_v61, %v1643_v30  ;;  %v1658_v2 = vpack.c.bf16 %v1644_v8, %v1640_v53  ;;  %v1660_v39 = vpack.c.bf16 %v1646_v57, %v1642_v7  ;;  %v1671_v38 = vpop.permute.xlu1 %1670 }
 0x234   : > { %p2000_p2 = por %p1999_p1, %p1998_p0 }
 0x235   : > { %1701 = vmatprep.subr.bf16.mxu0 %v1659_v45  ;;  %1744 = vmatprep.subr.bf16.mxu1 %v1661_v33 }
 0x236   : > { %1702 = vmatpush1.bf16.msra.mxu0 %v1658_v2  ;;  %1745 = vmatpush1.bf16.msra.mxu1 %v1660_v39  ;;  %p2001_p3 = pnand %p2000_p2, %p1994_p13 }
 0x239   : > { %1886 = vmatmul.mubr.msk.bf16.vlgmr.msra.gmra.mxu0 %vm1683_vm4, %v1982_v46  ;;  %1887 = vmatmul.mubr.msk.bf16.vlgmr.msra.gmra.mxu1 %vm1683_vm4, %v1982_v46 }
 0x2f9   : > { %v1721_v26 = vpop.f32.mrf.mxu0  ;;  %v1764_v48 = vpop.f32.mrf.mxu1 }
 0x2fa   : > { %v1722_v47 = vadd.f32 %v1721_v26, %v1671_v38  ;;  %v1765_v1 = vadd.f32 %v1764_v48, %v1671_v38 }
 0x2fb   : > { %v1723_v23 = vpop.f32.mrf.mxu0  ;;  %v1766_v9 = vpop.f32.mrf.mxu1 }
 0x2fc   : > { %v1773_v22 = vadd.f32 %v1983_v15, %v1722_v47  ;;  %v1775_v55 = vadd.f32 %v1984_v27, %v1765_v1  ;;  %v1724_v17 = vadd.f32 %v1723_v23, %v1671_v38  ;;  %v1767_v19 = vadd.f32 %v1766_v9, %v1671_v38 }
 0x2fd   : > { %v1725_v54 = vpop.f32.mrf.mxu0  ;;  %v1768_v11 = vpop.f32.mrf.mxu1 }
 0x2fe   : > { %1781 = vst [vmem:[%s355_s11] sm:$0xff] %v1773_v22  ;;  %1888 = vst [vmem:[%s355_s11 + $0x20] sm:$0xff] %v1775_v55  ;;  %v1774_v42 = vadd.f32 %v1985_v58, %v1724_v17  ;;  %v1776_v49 = vadd.f32 %v1986_v35, %v1767_v19  ;;  %v1726_v43 = vadd.f32 %v1725_v54, %v1676_v63 }
 0x2ff   : > { %v1769_v16 = vadd.f32 %v1768_v11, %v1676_v63  ;;  %v1727_v21 = vpop.f32.mrf.mxu0  ;;  %v1770_v24 = vpop.f32.mrf.mxu1 }
 0x300   : > { %1782 = vst [vmem:[%s355_s11 + $0x8] sm:$0xff] %v1774_v42  ;;  %1889 = vst [vmem:[%s355_s11 + $0x28] sm:$0xff] %v1776_v49  ;;  %v1777_v62 = vadd.f32 %v1987_v52, %v1726_v43  ;;  %v1728_v59 = vadd.f32 %v1727_v21, %v1676_v63  ;;  %v1771_v40 = vadd.f32 %v1770_v24, %v1676_v63 }
 0x301   : > { %v1779_v60 = vadd.f32 %v1988_v3, %v1769_v16 }
 0x302   : > { %1783 = vst [vmem:[%s355_s11 + $0x10] sm:$0xff] %v1777_v62  ;;  %v1778_v0 = vadd.f32 %v1989_v31, %v1728_v59  ;;  %v1780_v12 = vadd.f32 %v1990_v51, %v1771_v40 }
 0x303   : > { %1890 = vst [vmem:[%s355_s11 + $0x30] sm:$0xff] %v1779_v60 }
 0x304   : > { %1784 = vst [vmem:[%s355_s11 + $0x18] sm:$0xff] %v1778_v0  ;;  %1891 = vst [vmem:[%s355_s11 + $0x38] sm:$0xff] %v1780_v12 }
 0x305   : > { %2004 = shalt.err (!%p2001_p3)
}
 0x306   : > { %s2005_s25 = scalar_lea.hbm %s3289_s18, 1024  ;;  %s2009_s12 = scalar_lea.hbm %s3348_s10, 2048 }
 0x307   : > { %p2006_p4 = scmp.ne.s32.totalorder %s3289_s18, %s2005_s25  ;;  %p2010_p9 = scmp.lt.s32.totalorder %s3289_s18, %s3348_s10 }
 0x308   : > { %p2011_p10 = scmp.lt.s32.totalorder %s2009_s12, %s2005_s25 }
 0x309   : > { %p2007_p7 = pnand %p2006_p4, %p2161_p5 }
 0x30a   : > { %p2012_p11 = por %p2011_p10, %p2010_p9 }
 0x30b   : > { %p2008_p8 = pneg %p2007_p7 }
 0x30d   : > { %p2013_p12 = pnand %p2012_p11, %p2008_p8 }
 0x30f   : > { %2016 = shalt.err (!%p2013_p12)
}
 0x310   : > { %s2067_s20 = smov 256   ;;  %s3485_s30 = smov 16  }
 0x311   : > { %1901 = dma.vmem_to_hbm [thread:$0]  (%p2161_p5), %s3293_s29, 1024, %s3289_s18, %s3297_s17, %s2067_s20, %s2067_s20, %s3485_s30  }
 0x312 PF: > { %p1907_p13 = scmp.ge.s32.totalorder %s2051_s16, 2  ;;  %s1820_s28 = sand.u32 1, %s2039_s13  }
 0x313   : > { %s1821_s25 = scalar_lea.sflag [#allocation3], %s1820_s28 }
 0x314   : > { %p1904_p0 = pnand %p1907_p13, %p2165_p6 }
 0x316   : > { %p1905_p1 = pneg %p1904_p0 }
 0x318   : > { %2034 = dma.done.wait (%p1905_p1), %s1821_s25, 1024  }
 0x319   : > { %2036 = vsyncadd (%p1905_p1), %s1821_s25, 4294966272  ;;  %p20_p2 = scmp.ge.s32.totalorder %s2148_s19, 4   ;;  %s3486_s13 = smov %s2043_s14 }
 0x31a   : > { %s3487_s14 = smov %s2047_s15  ;;  %s3488_s15 = smov %s2159_s22 }
 0x31b   : > { %s3489_s16 = smov %s2148_s19  ;;  %22 = sbr.rel (!%p20_p2) target bundleno = 3 (0x3), region = 97 }
 0x320   :  { %1826 = vsyncpa [#allocation3], 1 }
 0x321   :  { %1828 = vsyncpa [#allocation3 + $0x1], 1 }

</bundles_post_ra>
